<compile_context>
chip_gen: v5e
topology: v5e:2x2
jax: 0.10.0
libtpu: 0.0.40
codegen_flags: <defaults>
</compile_context>

<pallas_src>
import functools

import jax
import jax.numpy as jnp
from jax import lax
from jax.experimental import pallas as pl
from jax.experimental.pallas import tpu as pltpu

_VMEM_LIMIT = 64 * 1024 * 1024  # <= v7x physical (64 MiB); ample on v5e/v6e (128 MiB)


def _round_up(x, m):
    return (x + m - 1) // m * m


def _compiler_params():
    # "parallel": grid steps write disjoint blocks, so the axis can shard
    # across the two v7x TensorCores (megacore-safe).
    return pltpu.CompilerParams(dimension_semantics=("parallel",),
                                vmem_limit_bytes=_VMEM_LIMIT)


# ---------------------------------------------------------------------------
# Kernel 1a: stride-1 conv, im2col folded into the kernel (one image per step)
# ---------------------------------------------------------------------------
def _conv_stats_slab_kernel(x_ref, w_ref, conv_ref, stats_ref, *,
                            tap_offsets, rows, wp, wo):
    # x_ref:    (1, Lpad, Cin)   bf16 flattened padded image (+ KW-1 zero rows)
    # w_ref:    (KH*KW, Cin, Cp) bf16 packed weight (Cout padded lane-dense)
    # conv_ref: (1, rows, Cp)    bf16 conv output (rows = Ho*Wp, junk cols incl.)
    # stats_ref:(1, 2, Cp)       f32  [sum, sum_sq] per channel, valid cols only
    cp = w_ref.shape[-1]
    acc = jnp.zeros((rows, cp), jnp.float32)
    for t, off in enumerate(tap_offsets):          # static unroll over KH*KW taps
        lhs = x_ref[0, pl.ds(off, rows), :]        # (rows, Cin), static slice
        acc = acc + jnp.dot(lhs, w_ref[t], preferred_element_type=jnp.float32)
    conv_ref[0, :, :] = acc.astype(conv_ref.dtype)
    # Mask wrap-around columns (w' >= Wo) out of the BatchNorm partial stats.
    col = lax.broadcasted_iota(jnp.int32, (rows, cp), 0) % wp
    accv = jnp.where(col < wo, acc, 0.0)
    stats_ref[:, 0, :] = jnp.sum(accv, axis=0, keepdims=True)
    stats_ref[:, 1, :] = jnp.sum(accv * accv, axis=0, keepdims=True)


def _conv_stride1(x_pad, w_oihw, cp):
    """Stride-1 conv + partial BN stats; grid over the batch dimension."""
    n, hp, wp, cin = x_pad.shape
    cout, _, kh_, kw_ = w_oihw.shape
    ho, wo = hp - kh_ + 1, wp - kw_ + 1
    rows = ho * wp                         # per-image output rows (junk cols incl.)
    lpad = hp * wp + (kw_ - 1)             # keep the last tap's slab in bounds

    xf = x_pad.reshape(n, hp * wp, cin).astype(jnp.bfloat16)
    if lpad != hp * wp:
        xf = jnp.pad(xf, ((0, 0), (0, lpad - hp * wp), (0, 0)))
    w = jnp.transpose(w_oihw, (2, 3, 1, 0)).reshape(kh_ * kw_, cin, cout)
    w = jnp.pad(w, ((0, 0), (0, 0), (0, cp - cout))).astype(jnp.bfloat16)
    tap_offsets = tuple(a * wp + b for a in range(kh_) for b in range(kw_))

    cost = pl.CostEstimate(
        flops=2 * n * rows * cin * cp * kh_ * kw_, transcendentals=0,
        bytes_accessed=(n * lpad * cin * 2 + kh_ * kw_ * cin * cp * 2
                        + n * rows * cp * 2 + n * 2 * cp * 4))

    # TODO(synk): for very large feature maps, add halo-blocked Ho tiling
    # (manual DMA via pl.ANY) so per-step VMEM stays bounded.
    conv_out, part_stats = pl.pallas_call(
        functools.partial(_conv_stats_slab_kernel, tap_offsets=tap_offsets,
                          rows=rows, wp=wp, wo=wo),
        out_shape=(jax.ShapeDtypeStruct((n, rows, cp), jnp.bfloat16),
                   jax.ShapeDtypeStruct((n, 2, cp), jnp.float32)),
        grid=(n,),
        in_specs=[pl.BlockSpec((1, lpad, cin), lambda i: (i, 0, 0)),
                  pl.BlockSpec((kh_ * kw_, cin, cp), lambda i: (0, 0, 0))],
        out_specs=(pl.BlockSpec((1, rows, cp), lambda i: (i, 0, 0)),
                   pl.BlockSpec((1, 2, cp), lambda i: (i, 0, 0))),
        compiler_params=_compiler_params(),
        cost_estimate=cost,
    )(xf, w)
    return conv_out.reshape(n * rows, cp), part_stats


# ---------------------------------------------------------------------------
# Kernel 1b: generic-stride fallback (im2col in XLA, single matmul per tile)
# ---------------------------------------------------------------------------
def _conv_stats_im2col_kernel(p_ref, w_ref, conv_ref, stats_ref):
    acc = jnp.dot(p_ref[...], w_ref[...], preferred_element_type=jnp.float32)
    conv_ref[...] = acc.astype(conv_ref.dtype)
    stats_ref[:, 0, :] = jnp.sum(acc, axis=0, keepdims=True)
    stats_ref[:, 1, :] = jnp.sum(acc * acc, axis=0, keepdims=True)


def _conv_im2col(x_pad, w_oihw, cp, stride, tile_m=512):
    # TODO(synk): still materializes (M, K) patches in XLA; a stride-phase
    # decomposition into stride-1 slab matmuls would remove the HBM inflation.
    n, hp, wp, cin = x_pad.shape
    cout, _, kh_, kw_ = w_oihw.shape
    ho = (hp - kh_) // stride + 1
    wo = (wp - kw_) // stride + 1
    m = n * ho * wo
    k = kh_ * kw_ * cin
    kp = _round_up(max(k, 128), 128)       # lane-dense contraction dim

    cols = []
    for a in range(kh_):
        for b in range(kw_):
            cols.append(x_pad[:, a:a + (ho - 1) * stride + 1:stride,
                              b:b + (wo - 1) * stride + 1:stride, :])
    patches = jnp.concatenate(cols, axis=-1).reshape(m, k).astype(jnp.bfloat16)
    patches = jnp.pad(patches, ((0, 0), (0, kp - k)))
    w = jnp.transpose(w_oihw, (2, 3, 1, 0)).reshape(k, cout)
    w = jnp.pad(w, ((0, kp - k), (0, cp - cout))).astype(jnp.bfloat16)

    tile_m = min(tile_m, _round_up(m, 8))
    num_tiles = pl.cdiv(m, tile_m)
    m_pad = num_tiles * tile_m
    if m_pad != m:                          # zero rows contribute 0 to the stats
        patches = jnp.pad(patches, ((0, m_pad - m), (0, 0)))

    cost = pl.CostEstimate(
        flops=2 * m_pad * kp * cp, transcendentals=0,
        bytes_accessed=(m_pad * kp * 2 + kp * cp * 2 + m_pad * cp * 2
                        + num_tiles * 2 * cp * 4))
    conv_out, part_stats = pl.pallas_call(
        _conv_stats_im2col_kernel,
        out_shape=(jax.ShapeDtypeStruct((m_pad, cp), jnp.bfloat16),
                   jax.ShapeDtypeStruct((num_tiles, 2, cp), jnp.float32)),
        grid=(num_tiles,),
        in_specs=[pl.BlockSpec((tile_m, kp), lambda i: (i, 0)),
                  pl.BlockSpec((kp, cp), lambda i: (0, 0))],
        out_specs=(pl.BlockSpec((tile_m, cp), lambda i: (i, 0)),
                   pl.BlockSpec((1, 2, cp), lambda i: (i, 0, 0))),
        compiler_params=_compiler_params(),
        cost_estimate=cost,
    )(patches, w)
    return conv_out, part_stats


# ---------------------------------------------------------------------------
# Kernel 2: y = conv * scale + shift (+ optional ReLU), lane-dense output
# ---------------------------------------------------------------------------
def _bn_act_kernel(conv_ref, scale_ref, shift_ref, o_ref, *, relu):
    y = conv_ref[...].astype(jnp.float32) * scale_ref[...] + shift_ref[...]
    if relu:
        y = jnp.maximum(y, 0.0)
    o_ref[...] = y.astype(o_ref.dtype)


def _bn_act(conv_flat, scale, shift, out_dtype, relu, tile_m=2048):
    m2, cp = conv_flat.shape
    tile_m = min(tile_m, _round_up(m2, 8))
    num_tiles = pl.cdiv(m2, tile_m)
    out_dtype = jnp.dtype(out_dtype)
    cost = pl.CostEstimate(
        flops=3 * m2 * cp, transcendentals=0,
        bytes_accessed=m2 * cp * (jnp.dtype(conv_flat.dtype).itemsize
                                  + out_dtype.itemsize) + 2 * cp * 4)
    aliases = {0: 0} if out_dtype == jnp.dtype(conv_flat.dtype) else {}
    return pl.pallas_call(
        functools.partial(_bn_act_kernel, relu=relu),
        out_shape=jax.ShapeDtypeStruct((m2, cp), out_dtype),
        grid=(num_tiles,),
        in_specs=[pl.BlockSpec((tile_m, cp), lambda i: (i, 0)),
                  pl.BlockSpec((1, cp), lambda i: (0, 0)),
                  pl.BlockSpec((1, cp), lambda i: (0, 0))],
        out_specs=pl.BlockSpec((tile_m, cp), lambda i: (i, 0)),
        compiler_params=_compiler_params(),
        cost_estimate=cost,
        input_output_aliases=aliases,
    )(conv_flat, scale, shift)


# ---------------------------------------------------------------------------
# Wrapper: BlockUnit forward (NCHW in, NCHW out)
# ---------------------------------------------------------------------------
def block_unit_forward(x_nchw, w_oihw, gamma, beta, *, stride=1, padding=0,
                       relu=False, eps=1e-5):
    n, cin, h, w_ = x_nchw.shape
    cout, cin_w, kh_, kw_ = w_oihw.shape
    assert cin == cin_w
    ho = (h + 2 * padding - kh_) // stride + 1
    wo = (w_ + 2 * padding - kw_) // stride + 1
    m = n * ho * wo                              # true BN population size
    cp = _round_up(max(cout, 128), 128)          # lane-dense output channels

    # glue (XLA): NCHW -> NHWC + spatial zero-pad (one input-sized pass)
    x = jnp.transpose(x_nchw, (0, 2, 3, 1))
    if padding:
        x = jnp.pad(x, ((0, 0), (padding, padding), (padding, padding), (0, 0)))

    if stride == 1:
        conv_flat, part_stats = _conv_stride1(x, w_oihw, cp)
    else:
        conv_flat, part_stats = _conv_im2col(x, w_oihw, cp, stride)

    # Fold training-mode biased batch stats + gamma/beta/eps into scale/shift.
    # NOTE: E[x^2]-E[x]^2 in f32; fine here, use Welford partials if the means
    # get large relative to the stds in real training.
    stats = part_stats.sum(axis=0).astype(jnp.float32)       # (2, Cp)
    mean = stats[0] / m
    var = jnp.maximum(stats[1] / m - mean * mean, 0.0)
    inv = lax.rsqrt(var + eps)
    gamma_p = jnp.pad(gamma.astype(jnp.float32), (0, cp - cout))
    beta_p = jnp.pad(beta.astype(jnp.float32), (0, cp - cout))
    scale = (gamma_p * inv).reshape(1, cp)
    shift = (beta_p - mean * gamma_p * inv).reshape(1, cp)

    out_flat = _bn_act(conv_flat, scale, shift, x_nchw.dtype, relu)

    # glue: strip junk columns / padding, back to NCHW
    if stride == 1:
        wp = w_ + 2 * padding
        out = out_flat.reshape(n, ho, wp, cp)[:, :, :wo, :cout]
    else:
        out = out_flat[:m, :cout].reshape(n, ho, wo, cout)
    return jnp.transpose(out, (0, 3, 1, 2))


def _reference(x, w, gamma, beta, *, stride, padding, relu, eps):
    """Pure-JAX reference (conv + training-mode BN + relu), NCHW, f32."""
    y = lax.conv_general_dilated(
        x, w, window_strides=(stride, stride),
        padding=[(padding, padding), (padding, padding)],
        dimension_numbers=("NCHW", "OIHW", "NCHW"))
    mean = y.mean(axis=(0, 2, 3), keepdims=True)
    var = ((y - mean) ** 2).mean(axis=(0, 2, 3), keepdims=True)
    yh = (y - mean) / jnp.sqrt(var + eps)
    out = yh * gamma.reshape(1, -1, 1, 1) + beta.reshape(1, -1, 1, 1)
    return jnp.maximum(out, 0.0) if relu else out


if __name__ == "__main__":
    # BlockUnit(4, 8, kernel_size=3, stride=1, padding=0, relu=True)
    N, Cin, H, W = 2, 4, 16, 16
    Cout, KH, KW = 8, 3, 3
    stride, padding, relu = 1, 0, True

    key = jax.random.PRNGKey(0)
    kx, kw = jax.random.split(key)
    x = jax.random.normal(kx, (N, Cin, H, W), dtype=jnp.float32)
    conv_w = 0.1 * jax.random.normal(kw, (Cout, Cin, KH, KW), dtype=jnp.float32)
    gamma = jnp.ones((Cout,), jnp.float32)   # BatchNorm2d default weight
    beta = jnp.zeros((Cout,), jnp.float32)   # BatchNorm2d default bias

    out = block_unit_forward(x, conv_w, gamma, beta,
                             stride=stride, padding=padding, relu=relu)
    out = jax.block_until_ready(out)

    ref = _reference(x, conv_w, gamma, beta,
                     stride=stride, padding=padding, relu=relu, eps=1e-5)
    assert out.shape == ref.shape, (out.shape, ref.shape)
    max_err = float(jnp.max(jnp.abs(out - ref)))
    # bf16 MXU operands + bf16 conv intermediate -> relaxed tolerance vs f32 ref.
    assert max_err < 5e-2, max_err

    print("KERNEL_OK")
</pallas_src>

<mosaic_0001>
module attributes {stable_mosaic.version = 11 : i64} {
  func.func @_conv_stats_slab_kernel(%arg0: i32, %arg1: memref<1x258x4xbf16, #tpu.memory_space<vmem>>, %arg2: memref<9x4x128xbf16, #tpu.memory_space<vmem>>, %arg3: memref<1x224x128xbf16, #tpu.memory_space<vmem>>, %arg4: memref<1x2x128xf32, #tpu.memory_space<vmem>>) attributes {dimension_semantics = [#tpu.dimension_semantics<parallel>], iteration_bounds = array<i64: 2>, scalar_prefetch = 0 : i64, scratch_operands = 0 : i64, tpu.core_type = #tpu.core_type<tc>, window_params = [{transform_indices = @transform_0, window_bounds = array<i64: 1, 258, 4>}, {pipeline_mode = #tpu.pipeline_mode<synchronous>, transform_indices = @transform_1, window_bounds = array<i64: 9, 4, 128>}, {transform_indices = @transform_2, window_bounds = array<i64: 1, 224, 128>}, {transform_indices = @transform_3, window_bounds = array<i64: 1, 2, 128>}]} {
    %cst = arith.constant 0.000000e+00 : f32
    %0 = vector.broadcast %cst : f32 to vector<224x128xf32>
    %c0 = arith.constant 0 : index
    %c0_0 = arith.constant 0 : index
    %c0_1 = arith.constant 0 : index
    %1 = vector.load %arg1[%c0, %c0_0, %c0_1] : memref<1x258x4xbf16, #tpu.memory_space<vmem>>, vector<1x224x4xbf16>
    %2 = vector.shape_cast %1 : vector<1x224x4xbf16> to vector<224x4xbf16>
    %c0_2 = arith.constant 0 : index
    %c0_3 = arith.constant 0 : index
    %c0_4 = arith.constant 0 : index
    %3 = vector.load %arg2[%c0_2, %c0_3, %c0_4] : memref<9x4x128xbf16, #tpu.memory_space<vmem>>, vector<1x4x128xbf16>
    %4 = vector.shape_cast %3 : vector<1x4x128xbf16> to vector<4x128xbf16>
    %cst_5 = arith.constant dense<0.000000e+00> : vector<224x128xf32>
    %5 = tpu.matmul %2, %4, %cst_5 {dimension_numbers = #tpu.dot_dimension_numbers<[1], [0], [0], [1], [0, 0, 1, 1], [], []>} : vector<224x4xbf16>, vector<4x128xbf16>, vector<224x128xf32> -> vector<224x128xf32>
    %6 = arith.addf %0, %5 : vector<224x128xf32>
    %c0_6 = arith.constant 0 : index
    %c1 = arith.constant 1 : index
    %c0_7 = arith.constant 0 : index
    %7 = vector.load %arg1[%c0_6, %c1, %c0_7] : memref<1x258x4xbf16, #tpu.memory_space<vmem>>, vector<1x224x4xbf16>
    %8 = vector.shape_cast %7 : vector<1x224x4xbf16> to vector<224x4xbf16>
    %c1_8 = arith.constant 1 : index
    %c0_9 = arith.constant 0 : index
    %c0_10 = arith.constant 0 : index
    %9 = vector.load %arg2[%c1_8, %c0_9, %c0_10] : memref<9x4x128xbf16, #tpu.memory_space<vmem>>, vector<1x4x128xbf16>
    %10 = vector.shape_cast %9 : vector<1x4x128xbf16> to vector<4x128xbf16>
    %cst_11 = arith.constant dense<0.000000e+00> : vector<224x128xf32>
    %11 = tpu.matmul %8, %10, %cst_11 {dimension_numbers = #tpu.dot_dimension_numbers<[1], [0], [0], [1], [0, 0, 1, 1], [], []>} : vector<224x4xbf16>, vector<4x128xbf16>, vector<224x128xf32> -> vector<224x128xf32>
    %12 = arith.addf %6, %11 : vector<224x128xf32>
    %c0_12 = arith.constant 0 : index
    %c2 = arith.constant 2 : index
    %c0_13 = arith.constant 0 : index
    %13 = vector.load %arg1[%c0_12, %c2, %c0_13] : memref<1x258x4xbf16, #tpu.memory_space<vmem>>, vector<1x224x4xbf16>
    %14 = vector.shape_cast %13 : vector<1x224x4xbf16> to vector<224x4xbf16>
    %c2_14 = arith.constant 2 : index
    %c0_15 = arith.constant 0 : index
    %c0_16 = arith.constant 0 : index
    %15 = vector.load %arg2[%c2_14, %c0_15, %c0_16] : memref<9x4x128xbf16, #tpu.memory_space<vmem>>, vector<1x4x128xbf16>
    %16 = vector.shape_cast %15 : vector<1x4x128xbf16> to vector<4x128xbf16>
    %cst_17 = arith.constant dense<0.000000e+00> : vector<224x128xf32>
    %17 = tpu.matmul %14, %16, %cst_17 {dimension_numbers = #tpu.dot_dimension_numbers<[1], [0], [0], [1], [0, 0, 1, 1], [], []>} : vector<224x4xbf16>, vector<4x128xbf16>, vector<224x128xf32> -> vector<224x128xf32>
    %18 = arith.addf %12, %17 : vector<224x128xf32>
    %c0_18 = arith.constant 0 : index
    %c16 = arith.constant 16 : index
    %c0_19 = arith.constant 0 : index
    %19 = vector.load %arg1[%c0_18, %c16, %c0_19] : memref<1x258x4xbf16, #tpu.memory_space<vmem>>, vector<1x224x4xbf16>
    %20 = vector.shape_cast %19 : vector<1x224x4xbf16> to vector<224x4xbf16>
    %c3 = arith.constant 3 : index
    %c0_20 = arith.constant 0 : index
    %c0_21 = arith.constant 0 : index
    %21 = vector.load %arg2[%c3, %c0_20, %c0_21] : memref<9x4x128xbf16, #tpu.memory_space<vmem>>, vector<1x4x128xbf16>
    %22 = vector.shape_cast %21 : vector<1x4x128xbf16> to vector<4x128xbf16>
    %cst_22 = arith.constant dense<0.000000e+00> : vector<224x128xf32>
    %23 = tpu.matmul %20, %22, %cst_22 {dimension_numbers = #tpu.dot_dimension_numbers<[1], [0], [0], [1], [0, 0, 1, 1], [], []>} : vector<224x4xbf16>, vector<4x128xbf16>, vector<224x128xf32> -> vector<224x128xf32>
    %24 = arith.addf %18, %23 : vector<224x128xf32>
    %c0_23 = arith.constant 0 : index
    %c17 = arith.constant 17 : index
    %c0_24 = arith.constant 0 : index
    %25 = vector.load %arg1[%c0_23, %c17, %c0_24] : memref<1x258x4xbf16, #tpu.memory_space<vmem>>, vector<1x224x4xbf16>
    %26 = vector.shape_cast %25 : vector<1x224x4xbf16> to vector<224x4xbf16>
    %c4 = arith.constant 4 : index
    %c0_25 = arith.constant 0 : index
    %c0_26 = arith.constant 0 : index
    %27 = vector.load %arg2[%c4, %c0_25, %c0_26] : memref<9x4x128xbf16, #tpu.memory_space<vmem>>, vector<1x4x128xbf16>
    %28 = vector.shape_cast %27 : vector<1x4x128xbf16> to vector<4x128xbf16>
    %cst_27 = arith.constant dense<0.000000e+00> : vector<224x128xf32>
    %29 = tpu.matmul %26, %28, %cst_27 {dimension_numbers = #tpu.dot_dimension_numbers<[1], [0], [0], [1], [0, 0, 1, 1], [], []>} : vector<224x4xbf16>, vector<4x128xbf16>, vector<224x128xf32> -> vector<224x128xf32>
    %30 = arith.addf %24, %29 : vector<224x128xf32>
    %c0_28 = arith.constant 0 : index
    %c18 = arith.constant 18 : index
    %c0_29 = arith.constant 0 : index
    %31 = vector.load %arg1[%c0_28, %c18, %c0_29] : memref<1x258x4xbf16, #tpu.memory_space<vmem>>, vector<1x224x4xbf16>
    %32 = vector.shape_cast %31 : vector<1x224x4xbf16> to vector<224x4xbf16>
    %c5 = arith.constant 5 : index
    %c0_30 = arith.constant 0 : index
    %c0_31 = arith.constant 0 : index
    %33 = vector.load %arg2[%c5, %c0_30, %c0_31] : memref<9x4x128xbf16, #tpu.memory_space<vmem>>, vector<1x4x128xbf16>
    %34 = vector.shape_cast %33 : vector<1x4x128xbf16> to vector<4x128xbf16>
    %cst_32 = arith.constant dense<0.000000e+00> : vector<224x128xf32>
    %35 = tpu.matmul %32, %34, %cst_32 {dimension_numbers = #tpu.dot_dimension_numbers<[1], [0], [0], [1], [0, 0, 1, 1], [], []>} : vector<224x4xbf16>, vector<4x128xbf16>, vector<224x128xf32> -> vector<224x128xf32>
    %36 = arith.addf %30, %35 : vector<224x128xf32>
    %c0_33 = arith.constant 0 : index
    %c32 = arith.constant 32 : index
    %c0_34 = arith.constant 0 : index
    %37 = vector.load %arg1[%c0_33, %c32, %c0_34] : memref<1x258x4xbf16, #tpu.memory_space<vmem>>, vector<1x224x4xbf16>
    %38 = vector.shape_cast %37 : vector<1x224x4xbf16> to vector<224x4xbf16>
    %c6 = arith.constant 6 : index
    %c0_35 = arith.constant 0 : index
    %c0_36 = arith.constant 0 : index
    %39 = vector.load %arg2[%c6, %c0_35, %c0_36] : memref<9x4x128xbf16, #tpu.memory_space<vmem>>, vector<1x4x128xbf16>
    %40 = vector.shape_cast %39 : vector<1x4x128xbf16> to vector<4x128xbf16>
    %cst_37 = arith.constant dense<0.000000e+00> : vector<224x128xf32>
    %41 = tpu.matmul %38, %40, %cst_37 {dimension_numbers = #tpu.dot_dimension_numbers<[1], [0], [0], [1], [0, 0, 1, 1], [], []>} : vector<224x4xbf16>, vector<4x128xbf16>, vector<224x128xf32> -> vector<224x128xf32>
    %42 = arith.addf %36, %41 : vector<224x128xf32>
    %c0_38 = arith.constant 0 : index
    %c33 = arith.constant 33 : index
    %c0_39 = arith.constant 0 : index
    %43 = vector.load %arg1[%c0_38, %c33, %c0_39] : memref<1x258x4xbf16, #tpu.memory_space<vmem>>, vector<1x224x4xbf16>
    %44 = vector.shape_cast %43 : vector<1x224x4xbf16> to vector<224x4xbf16>
    %c7 = arith.constant 7 : index
    %c0_40 = arith.constant 0 : index
    %c0_41 = arith.constant 0 : index
    %45 = vector.load %arg2[%c7, %c0_40, %c0_41] : memref<9x4x128xbf16, #tpu.memory_space<vmem>>, vector<1x4x128xbf16>
    %46 = vector.shape_cast %45 : vector<1x4x128xbf16> to vector<4x128xbf16>
    %cst_42 = arith.constant dense<0.000000e+00> : vector<224x128xf32>
    %47 = tpu.matmul %44, %46, %cst_42 {dimension_numbers = #tpu.dot_dimension_numbers<[1], [0], [0], [1], [0, 0, 1, 1], [], []>} : vector<224x4xbf16>, vector<4x128xbf16>, vector<224x128xf32> -> vector<224x128xf32>
    %48 = arith.addf %42, %47 : vector<224x128xf32>
    %c0_43 = arith.constant 0 : index
    %c34 = arith.constant 34 : index
    %c0_44 = arith.constant 0 : index
    %49 = vector.load %arg1[%c0_43, %c34, %c0_44] : memref<1x258x4xbf16, #tpu.memory_space<vmem>>, vector<1x224x4xbf16>
    %50 = vector.shape_cast %49 : vector<1x224x4xbf16> to vector<224x4xbf16>
    %c8 = arith.constant 8 : index
    %c0_45 = arith.constant 0 : index
    %c0_46 = arith.constant 0 : index
    %51 = vector.load %arg2[%c8, %c0_45, %c0_46] : memref<9x4x128xbf16, #tpu.memory_space<vmem>>, vector<1x4x128xbf16>
    %52 = vector.shape_cast %51 : vector<1x4x128xbf16> to vector<4x128xbf16>
    %cst_47 = arith.constant dense<0.000000e+00> : vector<224x128xf32>
    %53 = tpu.matmul %50, %52, %cst_47 {dimension_numbers = #tpu.dot_dimension_numbers<[1], [0], [0], [1], [0, 0, 1, 1], [], []>} : vector<224x4xbf16>, vector<4x128xbf16>, vector<224x128xf32> -> vector<224x128xf32>
    %54 = arith.addf %48, %53 : vector<224x128xf32>
    %55 = arith.truncf %54 : vector<224x128xf32> to vector<224x128xbf16>
    %c0_48 = arith.constant 0 : index
    %c0_49 = arith.constant 0 : index
    %c0_50 = arith.constant 0 : index
    %56 = vector.load %arg3[%c0_48, %c0_49, %c0_50] : memref<1x224x128xbf16, #tpu.memory_space<vmem>>, vector<1x224x128xbf16>
    %57 = vector.shape_cast %56 : vector<1x224x128xbf16> to vector<224x128xbf16>
    %58 = vector.shape_cast %55 : vector<224x128xbf16> to vector<1x224x128xbf16>
    tpu.vector_store %arg3[%c0_48, %c0_49, %c0_50], %58 {strides = array<i32>} : memref<1x224x128xbf16, #tpu.memory_space<vmem>>, vector<1x224x128xbf16>,
    %59 = tpu.iota {dimensions = array<i32: 0>} : vector<224x128xi32>
    %c16_i32 = arith.constant 16 : i32
    %c0_i32 = arith.constant 0 : i32
    %60 = arith.cmpi eq, %c16_i32, %c0_i32 : i32
    %c1_i32 = arith.constant 1 : i32
    %61 = arith.select %60, %c1_i32, %c16_i32 : i32
    %62 = vector.broadcast %61 : i32 to vector<224x128xi32>
    %63 = arith.remsi %59, %62 : vector<224x128xi32>
    %c0_i32_51 = arith.constant 0 : i32
    %64 = vector.broadcast %c0_i32_51 : i32 to vector<224x128xi32>
    %65 = arith.cmpi ne, %63, %64 : vector<224x128xi32>
    %c0_i32_52 = arith.constant 0 : i32
    %66 = vector.broadcast %c0_i32_52 : i32 to vector<224x128xi32>
    %67 = arith.cmpi slt, %63, %66 : vector<224x128xi32>
    %c0_i32_53 = arith.constant 0 : i32
    %68 = arith.cmpi slt, %61, %c0_i32_53 : i32
    %69 = vector.broadcast %68 : i1 to vector<224x128xi1>
    %70 = vector.broadcast %69 : vector<224x128xi1> to vector<224x128xi1>
    %71 = arith.xori %67, %70 : vector<224x128xi1>
    %72 = arith.andi %71, %65 : vector<224x128xi1>
    %73 = vector.broadcast %61 : i32 to vector<224x128xi32>
    %74 = arith.addi %63, %73 : vector<224x128xi32>
    %75 = arith.select %72, %74, %63 : vector<224x128xi1>, vector<224x128xi32>
    %c14_i32 = arith.constant 14 : i32
    %76 = vector.broadcast %c14_i32 : i32 to vector<224x128xi32>
    %77 = arith.cmpi slt, %75, %76 : vector<224x128xi32>
    %cst_54 = arith.constant 0.000000e+00 : f32
    %78 = vector.broadcast %cst_54 : f32 to vector<224x128xf32>
    %79 = arith.select %77, %54, %78 : vector<224x128xi1>, vector<224x128xf32>
    %cst_55 = arith.constant dense<0.000000e+00> : vector<128xf32>
    %80 = vector.multi_reduction <add>, %79, %cst_55 [0] : vector<224x128xf32> to vector<128xf32>
    %81 = vector.shape_cast %80 : vector<128xf32> to vector<1x128xf32>
    %c0_56 = arith.constant 0 : index
    %c0_57 = arith.constant 0 : index
    %c0_58 = arith.constant 0 : index
    %82 = vector.load %arg4[%c0_56, %c0_57, %c0_58] : memref<1x2x128xf32, #tpu.memory_space<vmem>>, vector<1x1x128xf32>
    %83 = vector.shape_cast %82 : vector<1x1x128xf32> to vector<1x128xf32>
    %84 = vector.shape_cast %81 : vector<1x128xf32> to vector<1x1x128xf32>
    tpu.vector_store %arg4[%c0_56, %c0_57, %c0_58], %84 {strides = array<i32>} : memref<1x2x128xf32, #tpu.memory_space<vmem>>, vector<1x1x128xf32>,
    %85 = arith.mulf %79, %79 : vector<224x128xf32>
    %cst_59 = arith.constant dense<0.000000e+00> : vector<128xf32>
    %86 = vector.multi_reduction <add>, %85, %cst_59 [0] : vector<224x128xf32> to vector<128xf32>
    %87 = vector.shape_cast %86 : vector<128xf32> to vector<1x128xf32>
    %c0_60 = arith.constant 0 : index
    %c1_61 = arith.constant 1 : index
    %c0_62 = arith.constant 0 : index
    %88 = vector.load %arg4[%c0_60, %c1_61, %c0_62] : memref<1x2x128xf32, #tpu.memory_space<vmem>>, vector<1x1x128xf32>
    %89 = vector.shape_cast %88 : vector<1x1x128xf32> to vector<1x128xf32>
    %90 = vector.shape_cast %87 : vector<1x128xf32> to vector<1x1x128xf32>
    tpu.vector_store %arg4[%c0_60, %c1_61, %c0_62], %90 {strides = array<i32>} : memref<1x2x128xf32, #tpu.memory_space<vmem>>, vector<1x1x128xf32>,
    return
  }
  func.func @transform_0(%arg0: i32) -> (i32, i32, i32) {
    %c0_i32 = arith.constant 0 : i32
    %c0_i32_0 = arith.constant 0 : i32
    %c0_i32_1 = arith.constant 0 : i32
    return %arg0, %c0_i32, %c0_i32_0 : i32, i32, i32
  }
  func.func @transform_1(%arg0: i32) -> (i32, i32, i32) {
    %c0_i32 = arith.constant 0 : i32
    %c0_i32_0 = arith.constant 0 : i32
    %c0_i32_1 = arith.constant 0 : i32
    %c0_i32_2 = arith.constant 0 : i32
    return %c0_i32, %c0_i32_0, %c0_i32_1 : i32, i32, i32
  }
  func.func @transform_2(%arg0: i32) -> (i32, i32, i32) {
    %c0_i32 = arith.constant 0 : i32
    %c0_i32_0 = arith.constant 0 : i32
    %c0_i32_1 = arith.constant 0 : i32
    return %arg0, %c0_i32, %c0_i32_0 : i32, i32, i32
  }
  func.func @transform_3(%arg0: i32) -> (i32, i32, i32) {
    %c0_i32 = arith.constant 0 : i32
    %c0_i32_0 = arith.constant 0 : i32
    %c0_i32_1 = arith.constant 0 : i32
    return %arg0, %c0_i32, %c0_i32_0 : i32, i32, i32
  }
}

</mosaic_0001>

<bundles_post_ra>
// kernel: tpu_custom_call.1
= control target key start
LH: loop header
LB: loop body
LE: loop exit
PB: predicated region body
PF: predicated region fallthrough
CT: control target
= control target key end

     0   :  { %9 = vsyncpa [#allocation3], 0  ;;  %s4805_s0 = inlined_call_operand.vmem [shape: bf16[2,258,4], index: 0, kind: input, shape index: {}]   ;;  %s4806_s1 = inlined_call_operand.vmem [shape: bf16[9,4,128], index: 1, kind: input, shape index: {}]   ;;  %s4807_s2 = inlined_call_operand.hbm [shape: bf16[2,224,128], index: 2, kind: output, shape index: {0}]   ;;  %s4808_s3 = inlined_call_operand.hbm [shape: f32[2,2,128], index: 3, kind: output, shape index: {1}]  }
   0x1   :  { %11 = vsyncpa [#allocation3 + $0x1], 0 }
   0x2   :  { %12 = vsyncpa [#allocation5], 0 }
   0x3   :  { %14 = vsyncpa [#allocation5 + $0x1], 0  ;;  %s3908_s12 = smov 0   ;;  %s3910_s13 = smov 0  }
   0x4   :  { %s3912_s14 = smov 0   ;;  %s3914_s15 = smov 0  }
   0x5 LB: > { %s3929_s16 = sadd.s32 4294967295, %s3884_s15   ;;  %s3152_s17 = sadd.s32 4294967294, %s3884_s15   ;;  %s3884_s15 = sphi %s3914_s15, %s4830_s15   ;;  %s3880_s14 = sphi %s3912_s14, %s4829_s14   ;;  %s3876_s13 = sphi %s3910_s13, %s4828_s13   ;;  %s3872_s12 = sphi %s3908_s12, %s4827_s12  }
   0x6   : > { %s3933_s18 = sadd.s32 1, %s3884_s15   ;;  %s74_s19 = sadd.s32 1, %s3880_s14 }
   0x7   : > { %s71_s20 = ssub.s32 %s3884_s15, %s3933_s18  ;;  %p84_p0 = scmp.ne.s32.totalorder %s3880_s14, %s3876_s13 }
   0x8   : > { %p72_p1 = scmp.eq.s32.totalorder %s71_s20, 0  ;;  %p85_p2 = scmp.eq.s32.totalorder %s3929_s16, 1 }
   0x9   : > { %p90_p3 = scmp.ne.s32.totalorder %s3876_s13, %s3872_s12  ;;  %p91_p4 = scmp.eq.s32.totalorder %s3152_s17, 1 }
   0xa   : > { %s3944_s21 = scalar_select %p72_p1, %s3880_s14, %s74_s19  }
   0xb   : > { %p3946_p5 = por %p85_p2, %p84_p0  ;;  %p3950_p6 = por %p91_p4, %p90_p3 }
   0xc   : > { %p3155_p7 = scmp.ge.s32.totalorder %s3884_s15, 1  ;;  %p146_p8 = scmp.lt.s32.totalorder %s3884_s15, 3 }
   0xe   : > { %p147_p9 = pnand %p3155_p7, %p146_p8 }
  0x10   : > { %150 = sbr.rel (%p147_p9) target bundleno = 701 (0x2bd), region = 28 }
  0x15   : > { %v3158_v0 = vld [vmem:[%s4806_s1 + $0x2] sm:$0x3]  ;;  %vm446_vm0 = vcmask 1041408   ;;  %p175_p10 = scmp.lt.s32.totalorder %s3929_s16, 1  ;;  %v3239_v2 = vld [vmem:[%s4806_s1 + $0x4] sm:$0x3] }
  0x16   : > { %v448_v1 = vsel %vm446_vm0, %v3158_v0, 0  ;;  %v209_v3 = vld [vmem:[%s4806_s1] sm:$0x3]  ;;  %v718_v4 = vsel %vm446_vm0, %v3239_v2, 0  ;;  %v3325_v6 = vld [vmem:[%s4806_s1 + $0x8] sm:$0x3] }
  0x17   : > { %3738 = vmatpush.bf16.msra.mxu1 %v448_v1  ;;  %3739 = vmatpush.bf16.msra.mxu2 %v448_v1  ;;  %s176_s30 = scalar_select %p175_p10, %s3929_s16, 1  ;;  %v558_v5 = vsel %vm446_vm0, %v209_v3, 0  ;;  %v1342_v7 = vsel %vm446_vm0, %v3325_v6, 0  ;;  %vm286_vm1 = vsmask.f32 7424  ;;  %vm403_vm2 = vcmask 31744  }
  0x18   : > { %457 = vmatpush.bf16.msra.mxu0 %v448_v1  ;;  %3740 = vmatpush.bf16.msra.mxu3 %v448_v1  ;;  %v3254_v45 = vld [vmem:[%s4806_s1 + $0x6] sm:$0x3]  ;;  %vm645_vm3 = vcmask 1046528   ;;  %s4623_s29 = sand.u32 1, %s3876_s13   ;;  %s3743_s5 = smul.u32 112, %s3929_s16 }
  0x19   : > { %s3742_s6 = smul.u32 132, %s176_s30  ;;  %v970_v54 = vsel %vm446_vm0, %v3254_v45, 0  ;;  %s3023_s11 = scalar_lea.sflag [#allocation3], %s4623_s29 }
  0x1a   : > { %s3741_s30 = smul.u32 112, %s4623_s29  ;;  %s3039_s8 = scalar_lea.hbm %s4807_s2, %s3743_s5 }
  0x1b   : > { %727 = vmatpush.bf16.msrb.mxu2 %v718_v4  ;;  %567 = vmatpush.bf16.msrb.mxu1 %v558_v5  ;;  %s3977_s9 = scalar_lea.vmem %s4805_s0, %s3742_s6  ;;  %s3042_s10 = sshll.u32 %s3039_s8, 4  ;;  %s3043_s10 = int_to_ptr.hbm [resolvable:$true] %s3042_s10 }
  0x1c   : > { %1351 = vmatpush.bf16.msrb.mxu0 %v1342_v7  ;;  %v3980_v8 = vld [vmem:[%s3977_s9 + $0x20] sm:$0xff]  ;;  %v3983_v9 = vld [vmem:[%s3977_s9 + $0x28] sm:$0xff]  ;;  %v4025_v37 = vld [vmem:[%s3977_s9 + $0x30] sm:$0xff]  ;;  %979 = vmatpush.bf16.msrb.mxu3 %v970_v54  ;;  %s4641_s4 = scalar_lea.vmem [#allocation2], %s3741_s30  ;;  %s3804_s17 = sshra.s32 %s3043_s10, 4  ;;  %s3805_s17 = int_to_ptr.hbm [resolvable:$true] %s3804_s17 }
  0x1d   : > { %v3986_v10 = vld [vmem:[%s3977_s9 + $0x40] sm:$0xff]  ;;  %v3989_v11 = vld [vmem:[%s3977_s9 + $0x48] sm:$0xff]  ;;  %v319_v14 = vshll.u32 %v3980_v8, 16  ;;  %v323_v15 = vshrl.u32 %v3980_v8, 16  ;;  %v327_v16 = vshll.u32 %v3983_v9, 16  ;;  %v4028_v38 = vld [vmem:[%s3977_s9 + $0x50] sm:$0xff]  ;;  %p3811_p0 = scmp.lt.s32.totalorder %s3805_s17, %s4807_s2 }
  0x1e   : > { %v3992_v12 = vld [vmem:[%s3977_s9] sm:$0xff]   ;;  %v3995_v13 = vld [vmem:[%s3977_s9 + $0x8] sm:$0xff]  ;;  %v351_v17 = vshll.u32 %v3986_v10, 16  ;;  %v355_v18 = vshrl.u32 %v3986_v10, 16  ;;  %v359_v19 = vshll.u32 %v3989_v11, 16  ;;  %v4034_v42 = vld [vmem:[%s3977_s9 + $0x10] sm:$0xff] }
  0x1f   : > { %v288_v20 = vshrl.u32 %v3992_v12, 16  ;;  %v290_v21 = vshll.u32 %v3992_v12, 16  ;;  %v4005_v22 = vrot.slane %v319_v14, 1  ;;  %v329_v23 = vrot.slane %v327_v16, 1  ;;  %v4013_v31 = vld [vmem:[%s3977_s9 + $0x60] sm:$0xff]  ;;  %v4016_v32 = vld [vmem:[%s3977_s9 + $0x68] sm:$0xff] }
  0x20   : > { %v4007_v24 = vrot.slane %v351_v17, 1  ;;  %v295_v25 = vshll.u32 %v3995_v13, 16  ;;  %v361_v26 = vrot.slane %v359_v19, 1  ;;  %v383_v39 = vshll.u32 %v4013_v31, 16  ;;  %v210_v46 = vld [vmem:[%s3977_s9 + $0x70] sm:$0x1] }
  0x21   : > { %v292_v27 = vrot.slane %v290_v21, 1  ;;  %v325_v28 = vor.u32 %v323_v15, %v4005_v22  ;;  %v387_v40 = vshrl.u32 %v4013_v31, 16  ;;  %v391_v41 = vshll.u32 %v4016_v32, 16  ;;  %v4063_v5 = vld [vmem:[%s3977_s9 + $0x38] sm:$0xff]  ;;  %s3806_s19 = scalar_lea.hbm %s3805_s17, 112  ;;  %s3810_s25 = scalar_lea.hbm %s4807_s2, 224 }
  0x22   : > { %v357_v29 = vor.u32 %v355_v18, %v4007_v24  ;;  %v297_v30 = vrot.slane %v295_v25, 1  ;;  %v4036_v43 = vrot.slane %v383_v39, 1  ;;  %v331_v47 = vshrl.u32 %v3983_v9, 16  ;;  %v4066_v6 = vld [vmem:[%s3977_s9 + $0x58] sm:$0xff]  ;;  %p3807_p11 = scmp.ne.s32.totalorder %s3805_s17, %s3806_s19  ;;  %p3812_p1 = scmp.lt.s32.totalorder %s3810_s25, %s3806_s19 }
  0x23   : > { %v293_v33 = vor.u32 %v292_v27, %v288_v20  ;;  %v330_v34 = vsel %vm286_vm1, %v325_v28, %v329_v23  ;;  %v393_v44 = vrot.slane %v391_v41, 1  ;;  %v335_v48 = vshll.u32 %v4025_v37, 16  ;;  %v4069_v15 = vld [vmem:[%s3977_s9 + $0x18] sm:$0xff]  ;;  %v3392_v41 = vld [vmem:[%s4806_s1 + $0xa] sm:$0x3] }
  0x24   : > { %v362_v35 = vsel %vm286_vm1, %v357_v29, %v361_v26  ;;  %3215 = vmatmul.msk.bf16.vlgmr.msra.gmra.mxu1 %vm403_vm2, %v330_v34  ;;  %v363_v49 = vshrl.u32 %v3989_v11, 16  ;;  %v367_v50 = vshll.u32 %v4028_v38, 16  ;;  %v389_v51 = vor.u32 %v387_v40, %v4036_v43  ;;  %v3478_v40 = vld [vmem:[%s4806_s1 + $0xe] sm:$0x3]  ;;  %p3808_p12 = pnand %p3807_p11, %p3946_p5  ;;  %p3813_p2 = por %p3812_p1, %p3811_p0 }
  0x25   : > { %3219 = vmatmul.msk.bf16.vlgmr.msra.gmra.mxu2 %vm403_vm2, %v362_v35  ;;  %v298_v36 = vsel %vm286_vm1, %v293_v33, %v297_v30  ;;  %v299_v52 = vshrl.u32 %v3995_v13, 16  ;;  %v303_v53 = vshll.u32 %v4034_v42, 16  ;;  %v270_v55 = vunpack.c.l.b16 %v210_v46  ;;  %v3545_v46 = vld [vmem:[%s4806_s1 + $0x10] sm:$0x3] }
  0x26   : > { %3211 = vmatmul.msk.bf16.vlgmr.msra.gmra.mxu0 %vm403_vm2, %v298_v36  ;;  %v394_v56 = vsel %vm286_vm1, %v389_v51, %v393_v44  ;;  %v333_v57 = vor.u32 %v331_v47, %v329_v23  ;;  %v337_v58 = vrot.slane %v335_v48, 1  ;;  %v365_v59 = vor.u32 %v363_v49, %v361_v26  ;;  %v3407_v36 = vld [vmem:[%s4806_s1 + $0xc] sm:$0x3]  ;;  %p3809_p13 = pneg %p3808_p12 }
  0x27   : > { %3223 = vmatmul.msk.bf16.vlgmr.msra.gmra.mxu3 %vm403_vm2, %v394_v56  ;;  %v369_v60 = vrot.slane %v367_v50, 1  ;;  %v4052_v61 = vpack.c.b16 %v270_v55, %v270_v55  ;;  %v301_v62 = vor.u32 %v299_v52, %v297_v30  ;;  %v305_v63 = vrot.slane %v303_v53, 1  ;;  %v3578_v48 = vld [vmem:[%s3977_s9 + $0x8] sm:$0xff] }
  0x28   : > { %v338_v0 = vsel %vm286_vm1, %v333_v57, %v337_v58  ;;  %v395_v2 = vshrl.u32 %v4016_v32, 16  ;;  %v339_v16 = vshrl.u32 %v4025_v37, 16  ;;  %v343_v17 = vshll.u32 %v4063_v5, 16  ;;  %p3814_p3 = pnand %p3813_p2, %p3809_p13 }
  0x29   : > { %v370_v1 = vsel %vm286_vm1, %v365_v59, %v369_v60  ;;  %v399_v3 = vshll.u32 %v4052_v61, 16  ;;  %v306_v4 = vsel %vm286_vm1, %v301_v62, %v305_v63  ;;  %v371_v18 = vshrl.u32 %v4028_v38, 16  ;;  %v3714_v59 = vld [vmem:[%s3977_s9] sm:$0xf0]  ;;  %v4119_v62 = vld [vmem:[%s3977_s9 + $0x10] sm:$0xff] }
  0x2a   : > { %v397_v7 = vor.u32 %v395_v2, %v393_v44  ;;  %v375_v19 = vshll.u32 %v4066_v6, 16  ;;  %v307_v21 = vshrl.u32 %v4034_v42, 16  ;;  %v311_v23 = vshll.u32 %v4069_v15, 16 }
  0x2b   : > { %v401_v14 = vrot.slane %v399_v3, 1  ;;  %v341_v25 = vor.u32 %v339_v16, %v337_v58  ;;  %v345_v26 = vrot.slane %v343_v17, 1  ;;  %v373_v27 = vor.u32 %v371_v18, %v369_v60  ;;  %v3717_v58 = vld [vmem:[%s3977_s9 + $0x8] sm:$0xff]   ;;  %v3715_v60 = vld [vmem:[%s3977_s9] sm:$0xe]  ;;  %v4132_v17 = vld [vmem:[%s3977_s9 + $0x18] sm:$0xff] }
  0x2c   : > { %v377_v28 = vrot.slane %v375_v19, 1  ;;  %v309_v29 = vor.u32 %v307_v21, %v305_v63  ;;  %v313_v30 = vrot.slane %v311_v23, 1  ;;  %v1781_v39 = vsel %vm446_vm0, %v3407_v36, 0  ;;  %v3580_v18 = vld [vmem:[%s3977_s9 + $0x18] sm:$0xff] }
  0x2d   : > { %v402_v20 = vsel %vm286_vm1, %v397_v7, %v401_v14  ;;  %v346_v33 = vsel %vm286_vm1, %v341_v25, %v345_v26  ;;  %1790 = vmatpush.bf16.msra.mxu2 %v1781_v39  ;;  %v2153_v44 = vsel %vm446_vm0, %v3478_v40, 0  ;;  %v1529_v45 = vsel %vm446_vm0, %v3392_v41, 0  ;;  %v4160_v39 = vld [vmem:[%s3977_s9 + $0x28] sm:$0xff] }
  0x2e   : > { %v378_v34 = vsel %vm286_vm1, %v373_v27, %v377_v28  ;;  %v314_v35 = vsel %vm286_vm1, %v309_v29, %v313_v30  ;;  %2162 = vmatpush.bf16.msra.mxu3 %v2153_v44  ;;  %1538 = vmatpush.bf16.msra.mxu1 %v1529_v45  ;;  %v2340_v47 = vsel %vm446_vm0, %v3545_v46, 0  ;;  %v347_v49 = vshrl.u32 %v4063_v5, 16  ;;  %v4146_v27 = vld [vmem:[%s3977_s9 + $0x20] sm:$0xff]  ;;  %v3582_v40 = vld [vmem:[%s3977_s9 + $0x28] sm:$0xff] }
  0x2f   : > { %2349 = vmatpush.bf16.msra.mxu0 %v2340_v47  ;;  %v379_v50 = vshrl.u32 %v4066_v6, 16  ;;  %v315_v51 = vshrl.u32 %v4069_v15, 16  ;;  %v1186_v63 = vshll.u32 %v3717_v58, 16  ;;  %v647_v3 = vrot.slane %v3995_v13, 1 }
  0x30   : > { %v349_v52 = vor.u32 %v347_v49, %v345_v26  ;;  %v1195_v19 = vshrl.u32 %v4119_v62, 16  ;;  %v649_v21 = vrot.slane %v4034_v42, 1  ;;  %v1203_v29 = vshrl.u32 %v4132_v17, 16  ;;  %v4174_v49 = vld [vmem:[%s3977_s9 + $0x30] sm:$0xff] }
  0x31   : > { %v381_v53 = vor.u32 %v379_v50, %v377_v28  ;;  %v317_v54 = vor.u32 %v315_v51, %v313_v30  ;;  %v3581_v28 = vld [vmem:[%s3977_s9 + $0x20] sm:$0xff]  ;;  %v1207_v30 = vshll.u32 %v4146_v27, 16  ;;  %v1211_v41 = vshrl.u32 %v4146_v27, 16  ;;  %v3583_v50 = vld [vmem:[%s3977_s9 + $0x30] sm:$0xff] }
  0x32   : > { %v354_v55 = vsel %vm286_vm1, %v349_v52, %v4007_v24  ;;  %v3716_v24 = vor.u32 %v3715_v60, %v3714_v59  ;;  %v1215_v44 = vshll.u32 %v4160_v39, 16  ;;  %v653_v45 = vrot.slane %v3980_v8, 1  ;;  %v4192_v59 = vld [vmem:[%s3977_s9 + $0x38] sm:$0xff] }
  0x33   : > { %v386_v56 = vsel %vm286_vm1, %v381_v53, %v4036_v43  ;;  %v322_v57 = vsel %vm286_vm1, %v317_v54, %v4005_v22  ;;  %v1184_v43 = vshrl.u32 %v3717_v58, 16  ;;  %v1191_v22 = vshll.u32 %v4119_v62, 16 }
  0x34   : > { %3216 = vmatmul.msk.bf16.gmra.mxu1 %vm403_vm2, %v338_v0  ;;  %v3579_v0 = vld [vmem:[%s3977_s9 + $0x10] sm:$0xff]  ;;  %v646_v2 = vrot.slane %v3716_v24, 1  ;;  %v1217_v47 = vrot.slane %v1215_v44, 1  ;;  %v1219_v51 = vshrl.u32 %v4160_v39, 16  ;;  %v1223_v52 = vshll.u32 %v4174_v49, 16 }
  0x35   : > { %3220 = vmatmul.msk.bf16.gmra.mxu2 %vm403_vm2, %v370_v1  ;;  %v1188_v1 = vrot.slane %v1186_v63, 1  ;;  %v1193_v7 = vrot.slane %v1191_v22, 1  ;;  %v655_v53 = vrot.slane %v3983_v9, 1  ;;  %v3584_v63 = vld [vmem:[%s3977_s9 + $0x38] sm:$0xff] }
  0x36   : > { %3212 = vmatmul.msk.bf16.gmra.mxu0 %vm403_vm2, %v306_v4  ;;  %v648_v14 = vsel %vm645_vm3, %v646_v2, %v647_v3  ;;  %v1221_v54 = vor.u32 %v1219_v51, %v1217_v47 }
  0x37   : > { %3224 = vmatmul.msk.bf16.gmra.mxu3 %vm403_vm2, %v402_v20  ;;  %v1189_v4 = vor.u32 %v1188_v1, %v1184_v43  ;;  %v1199_v20 = vshll.u32 %v4132_v17, 16  ;;  %v1197_v23 = vor.u32 %v1195_v19, %v1193_v7  ;;  %v1227_v43 = vshrl.u32 %v4174_v49, 16  ;;  %v4220_v19 = vld [vmem:[%s3977_s9 + $0x40] sm:$0xff] }
  0x38   : > { %v1231_v1 = vshll.u32 %v4192_v59, 16 }
  0x39   : > { %v1194_v16 = vsel %vm286_vm1, %v1189_v4, %v1193_v7  ;;  %v1201_v25 = vrot.slane %v1199_v20, 1 }
  0x3a   : > { %v1233_v2 = vrot.slane %v1231_v1, 1 }
  0x3b   : > { %v1202_v26 = vsel %vm286_vm1, %v1197_v23, %v1201_v25  ;;  %v3585_v23 = vld [vmem:[%s3977_s9 + $0x40] sm:$0xff] }
  0x44   : > { %3217 = vmatmul.msk.bf16.gmra.mxu1 %vm403_vm2, %v346_v33  ;;  %v651_v33 = vrot.slane %v4069_v15, 1 }
  0x45   : > { %3221 = vmatmul.msk.bf16.gmra.mxu2 %vm403_vm2, %v378_v34  ;;  %v1205_v34 = vor.u32 %v1203_v29, %v1201_v25 }
  0x46   : > { %3213 = vmatmul.msk.bf16.gmra.mxu0 %vm403_vm2, %v314_v35  ;;  %v1209_v35 = vrot.slane %v1207_v30, 1 }
  0x47   : > { %3311 = vmatmul.msk.bf16.vlgmr.msrb.gmra.mxu3 %vm403_vm2, %v3578_v48 }
  0x48   : > { %v1210_v36 = vsel %vm286_vm1, %v1205_v34, %v1209_v35  ;;  %v1213_v46 = vor.u32 %v1211_v41, %v1209_v35  ;;  %v4250_v41 = vld [vmem:[%s3977_s9 + $0x48] sm:$0xff] }
  0x4a   : > { %v1218_v48 = vsel %vm286_vm1, %v1213_v46, %v1217_v47  ;;  %v3586_v46 = vld [vmem:[%s3977_s9 + $0x48] sm:$0xff] }
  0x54   : > { %3218 = vmatmul.msk.bf16.gmra.mxu1 %vm403_vm2, %v354_v55  ;;  %v1225_v55 = vrot.slane %v1223_v52, 1 }
  0x55   : > { %3222 = vmatmul.msk.bf16.gmra.mxu2 %vm403_vm2, %v386_v56  ;;  %v656_v56 = vsel %vm645_vm3, %v653_v45, %v655_v53 }
  0x56   : > { %3214 = vmatmul.msk.bf16.gmra.mxu0 %vm403_vm2, %v322_v57  ;;  %v1226_v58 = vsel %vm286_vm1, %v1221_v54, %v1225_v55  ;;  %v1229_v22 = vor.u32 %v1227_v43, %v1225_v55  ;;  %v4278_v43 = vld [vmem:[%s3977_s9 + $0x50] sm:$0xff] }
  0x57   : > { %3312 = vmatmul.msk.bf16.gmra.mxu3 %vm403_vm2, %v3579_v0  ;;  %4814 = vst [vmem:[#allocation9_spill] sm:$0xff] %v4278_v43 }
  0x64   : > { %3225 = vmatmul.msk.bf16.vlgmr.msrb.gmra.mxu1 %vm403_vm2, %v3992_v12  ;;  %v650_v12 = vsel %vm645_vm3, %v647_v3, %v649_v21 }
  0x65   : > { %3240 = vmatmul.msk.bf16.vlgmr.msrb.gmra.mxu2 %vm403_vm2, %v648_v14 }
  0x66   : > { %3378 = vmatmul.msk.bf16.vlgmr.msrb.gmra.mxu0 %vm403_vm2, %v1194_v16 }
  0x67   : > { %3313 = vmatmul.msk.bf16.gmra.mxu3 %vm403_vm2, %v3580_v18  ;;  %v1234_v18 = vsel %vm286_vm1, %v1229_v22, %v1233_v2  ;;  %v3587_v22 = vld [vmem:[%s3977_s9 + $0x50] sm:$0xff] }
  0x74   : > { %3226 = vmatmul.msk.bf16.gmra.mxu1 %vm403_vm2, %v3995_v13  ;;  %v652_v13 = vsel %vm645_vm3, %v649_v21, %v651_v33 }
  0x75   : > { %3241 = vmatmul.msk.bf16.gmra.mxu2 %vm403_vm2, %v650_v12 }
  0x76   : > { %3379 = vmatmul.msk.bf16.gmra.mxu0 %vm403_vm2, %v1202_v26  ;;  %v1235_v26 = vshrl.u32 %v4192_v59, 16 }
  0x77   : > { %3314 = vmatmul.msk.bf16.gmra.mxu3 %vm403_vm2, %v3581_v28  ;;  %v659_v28 = vrot.slane %v4063_v5, 1 }
  0x78   : > { %v1237_v29 = vor.u32 %v1235_v26, %v1233_v2 }
  0x84   : > { %3227 = vmatmul.msk.bf16.gmra.mxu1 %vm403_vm2, %v4034_v42  ;;  %v654_v42 = vsel %vm645_vm3, %v651_v33, %v653_v45 }
  0x85   : > { %3242 = vmatmul.msk.bf16.gmra.mxu2 %vm403_vm2, %v652_v13 }
  0x86   : > { %3380 = vmatmul.msk.bf16.gmra.mxu0 %vm403_vm2, %v1210_v36 }
  0x87   : > { %3315 = vmatmul.msk.bf16.gmra.mxu3 %vm403_vm2, %v3582_v40 }
  0x94   : > { %3228 = vmatmul.msk.bf16.gmra.mxu1 %vm403_vm2, %v4069_v15 }
  0x95   : > { %3243 = vmatmul.msk.bf16.gmra.mxu2 %vm403_vm2, %v654_v42 }
  0x96   : > { %3381 = vmatmul.msk.bf16.gmra.mxu0 %vm403_vm2, %v1218_v48  ;;  %v1243_v48 = vshrl.u32 %v4220_v19, 16 }
  0x97   : > { %3316 = vmatmul.msk.bf16.gmra.mxu3 %vm403_vm2, %v3583_v50  ;;  %v661_v50 = vrot.slane %v3986_v10, 1 }
  0xa1   : > { %v4181_v15 = vpop.f32.mrf.mxu1 }
  0xa3   : > { %v4184_v57 = vpop.f32.mrf.mxu0 }
  0xa4   : > { %3229 = vmatmul.msk.bf16.gmra.mxu1 %vm403_vm2, %v3980_v8  ;;  %v657_v8 = vrot.slane %v4025_v37, 1 }
  0xa5   : > { %3244 = vmatmul.msk.bf16.gmra.mxu2 %vm403_vm2, %v656_v56  ;;  %v662_v56 = vsel %vm645_vm3, %v659_v28, %v661_v50 }
  0xa6   : > { %3382 = vmatmul.msk.bf16.gmra.mxu0 %vm403_vm2, %v1226_v58  ;;  %v658_v14 = vsel %vm645_vm3, %v655_v53, %v657_v8  ;;  %v660_v13 = vsel %vm645_vm3, %v657_v8, %v659_v28 }
  0xa7   : > { %3317 = vmatmul.msk.bf16.gmra.mxu3 %vm403_vm2, %v3584_v63 }
  0xa8   : > { %v4194_v60 = vpop.f32.mrf.mxu2 }
  0xa9   : > { %v4197_v0 = vpop.f32.mrf.mxu1 }
  0xaa   : > { %v4207_v4 = vpop.f32.mrf.mxu3 }
  0xab   : > { %v4199_v24 = vpop.f32.mrf.mxu0 }
  0xb0   : > { %v4205_v3 = vpop.f32.mrf.mxu2 }
  0xb1   : > { %v4209_v7 = vpop.f32.mrf.mxu1 }
  0xb2   : > { %v4224_v21 = vpop.f32.mrf.mxu3 }
  0xb3   : > { %v4212_v16 = vpop.f32.mrf.mxu0 }
  0xb4   : > { %3230 = vmatmul.msk.bf16.gmra.mxu1 %vm403_vm2, %v3983_v9  ;;  %v1239_v9 = vshll.u32 %v4220_v19, 16 }
  0xb5   : > { %3245 = vmatmul.msk.bf16.gmra.mxu2 %vm403_vm2, %v658_v14 }
  0xb6   : > { %3383 = vmatmul.msk.bf16.gmra.mxu0 %vm403_vm2, %v1234_v18  ;;  %v1241_v30 = vrot.slane %v1239_v9, 1  ;;  %v1251_v18 = vshrl.u32 %v4250_v41, 16 }
  0xb7   : > { %3318 = vmatmul.msk.bf16.gmra.mxu3 %vm403_vm2, %v3585_v23  ;;  %v1255_v23 = vshll.u32 %v4278_v43, 16 }
  0xb8   : > { %v4222_v20 = vpop.f32.mrf.mxu2  ;;  %v1242_v40 = vsel %vm286_vm1, %v1237_v29, %v1241_v30  ;;  %v1245_v51 = vor.u32 %v1243_v48, %v1241_v30 }
  0xb9   : > { %v4227_v25 = vpop.f32.mrf.mxu1  ;;  %v1257_v9 = vrot.slane %v1255_v23, 1  ;;  %v1259_v23 = vshrl.u32 %v4278_v43, 16 }
  0xba   : > { %v4237_v34 = vpop.f32.mrf.mxu3 }
  0xbb   : > { %v4229_v12 = vpop.f32.mrf.mxu0 }
  0xc0   : > { %v4235_v33 = vpop.f32.mrf.mxu2 }
  0xc1   : > { %v4239_v35 = vpop.f32.mrf.mxu1 }
  0xc2   : > { %v4254_v45 = vpop.f32.mrf.mxu3 }
  0xc3   : > { %v4242_v36 = vpop.f32.mrf.mxu0  ;;  %4813 = vst [vmem:[#allocation8_spill] sm:$0xff] %v4254_v45 }
  0xc4   : > { %3231 = vmatmul.msk.bf16.gmra.mxu1 %vm403_vm2, %v4025_v37  ;;  %v1247_v37 = vshll.u32 %v4250_v41, 16 }
  0xc5   : > { %3246 = vmatmul.msk.bf16.gmra.mxu2 %vm403_vm2, %v660_v13 }
  0xc6   : > { %3384 = vmatmul.msk.bf16.gmra.mxu0 %vm403_vm2, %v1242_v40  ;;  %v1249_v52 = vrot.slane %v1247_v37, 1  ;;  %v4301_v37 = vld [vmem:[%s3977_s9 + $0x58] sm:$0xff] }
  0xc7   : > { %3319 = vmatmul.msk.bf16.gmra.mxu3 %vm403_vm2, %v3586_v46 }
  0xc8   : > { %v4252_v44 = vpop.f32.mrf.mxu2  ;;  %v1250_v63 = vsel %vm286_vm1, %v1245_v51, %v1249_v52  ;;  %v1253_v26 = vor.u32 %v1251_v18, %v1249_v52 }
  0xc9   : > { %v4257_v47 = vpop.f32.mrf.mxu1 }
  0xca   : > { %v981_v54 = vpop.f32.mrf.mxu3  ;;  %v1258_v48 = vsel %vm286_vm1, %v1253_v26, %v1257_v9  ;;  %v1263_v26 = vshll.u32 %v4301_v37, 16 }
  0xcb   : > { %v4259_v42 = vpop.f32.mrf.mxu0 }
  0xd0   : > { %v4265_v53 = vpop.f32.mrf.mxu2 }
  0xd1   : > { %v4267_v55 = vpop.f32.mrf.mxu1 }
  0xd2   : > { %v983_v8 = vpop.f32.mrf.mxu3 }
  0xd3   : > { %v4270_v58 = vpop.f32.mrf.mxu0 }
  0xd4   : > { %3232 = vmatmul.msk.bf16.gmra.mxu1 %vm403_vm2, %v4063_v5  ;;  %v663_v5 = vrot.slane %v3989_v11, 1 }
  0xd5   : > { %3247 = vmatmul.msk.bf16.gmra.mxu2 %vm403_vm2, %v662_v56 }
  0xd6   : > { %3385 = vmatmul.msk.bf16.gmra.mxu0 %vm403_vm2, %v1250_v63  ;;  %v664_v13 = vsel %vm645_vm3, %v661_v50, %v663_v5  ;;  %v3588_v63 = vld [vmem:[%s3977_s9 + $0x58] sm:$0xff] }
  0xd7   : > { %3320 = vmatmul.msk.bf16.gmra.mxu3 %vm403_vm2, %v3587_v22 }
  0xd8   : > { %v4280_v1 = vpop.f32.mrf.mxu2 }
  0xd9   : > { %v4283_v2 = vpop.f32.mrf.mxu1 }
  0xda   : > { %v986_v29 = vpop.f32.mrf.mxu3 }
  0xdb   : > { %v4285_v14 = vpop.f32.mrf.mxu0 }
  0xe0   : > { %v4291_v28 = vpop.f32.mrf.mxu2 }
  0xe1   : > { %v569_v30 = vpop.f32.mrf.mxu1 }
  0xe2   : > { %v570_v40 = vadd.f32 %v569_v30, %v4184_v57  ;;  %v988_v52 = vpop.f32.mrf.mxu3  ;;  %v665_v30 = vrot.slane %v4028_v38, 1 }
  0xe3   : > { %v1353_v46 = vpop.f32.mrf.mxu0 }
  0xe4   : > { %3233 = vmatmul.msk.bf16.gmra.mxu1 %vm403_vm2, %v3986_v10 }
  0xe5   : > { %3248 = vmatmul.msk.bf16.gmra.mxu2 %vm403_vm2, %v664_v13  ;;  %v1261_v13 = vor.u32 %v1259_v23, %v1257_v9 }
  0xe6   : > { %3386 = vmatmul.msk.bf16.gmra.mxu0 %vm403_vm2, %v1258_v48  ;;  %v1265_v48 = vrot.slane %v1263_v26, 1 }
  0xe7   : > { %3321 = vmatmul.msk.bf16.gmra.mxu3 %vm403_vm2, %v3588_v63 }
  0xe8   : > { %v729_v51 = vpop.f32.mrf.mxu2  ;;  %v1266_v63 = vsel %vm286_vm1, %v1261_v13, %v1265_v48 }
  0xe9   : > { %v799_v56 = vadd.f32 %v729_v51, %v570_v40  ;;  %v571_v22 = vpop.f32.mrf.mxu1 }
  0xea   : > { %v572_v57 = vadd.f32 %v571_v22, %v4199_v24  ;;  %v991_v51 = vpop.f32.mrf.mxu3  ;;  %v666_v24 = vsel %vm645_vm3, %v663_v5, %v665_v30 }
  0xeb   : > { %v1051_v50 = vadd.f32 %v981_v54, %v799_v56  ;;  %v1355_v18 = vpop.f32.mrf.mxu0 }
  0xed   : > { %v4308_v10 = vadd.f32 %v1353_v46, %v1051_v50  ;;  %v4321_v46 = vld [vmem:[%s3977_s9 + $0x60] sm:$0xff] }
  0xf0   : > { %v731_v40 = vpop.f32.mrf.mxu2 }
  0xf1   : > { %v800_v54 = vadd.f32 %v731_v40, %v572_v57  ;;  %v574_v56 = vpop.f32.mrf.mxu1  ;;  %v1267_v40 = vshrl.u32 %v4301_v37, 16 }
  0xf2   : > { %v575_v45 = vadd.f32 %v574_v56, %v4212_v16  ;;  %v993_v57 = vpop.f32.mrf.mxu3 }
  0xf3   : > { %v1052_v22 = vadd.f32 %v983_v8, %v800_v54  ;;  %v1358_v43 = vpop.f32.mrf.mxu0  ;;  %v3589_v8 = vld [vmem:[%s3977_s9 + $0x60] sm:$0xff]  ;;  %v667_v54 = vrot.slane %v4066_v6, 1  ;;  %v1269_v56 = vor.u32 %v1267_v40, %v1265_v48  ;;  %v4341_v48 = vld [vmem:[%s3977_s9 + $0x68] sm:$0xff] }
  0xf4   : > { %3234 = vmatmul.msk.bf16.gmra.mxu1 %vm403_vm2, %v3989_v11  ;;  %v1271_v11 = vshll.u32 %v4321_v46, 16  ;;  %4816 = vst [vmem:[#allocation11_spill] sm:$0xff] %v4341_v48 }
  0xf5   : > { %3249 = vmatmul.msk.bf16.gmra.mxu2 %vm403_vm2, %v666_v24  ;;  %v4317_v9 = vadd.f32 %v1355_v18, %v1052_v22 }
  0xf6   : > { %3387 = vmatmul.msk.bf16.gmra.mxu0 %vm403_vm2, %v1266_v63  ;;  %v1273_v24 = vrot.slane %v1271_v11, 1 }
  0xf7   : > { %3322 = vmatmul.msk.bf16.gmra.mxu3 %vm403_vm2, %v3589_v8 }
  0xf8   : > { %v734_v50 = vpop.f32.mrf.mxu2  ;;  %v1274_v8 = vsel %vm286_vm1, %v1269_v56, %v1273_v24 }
  0xf9   : > { %v801_v5 = vadd.f32 %v734_v50, %v575_v45  ;;  %v576_v23 = vpop.f32.mrf.mxu1 }
  0xfa   : > { %v577_v26 = vadd.f32 %v576_v23, %v4229_v12  ;;  %v996_v22 = vpop.f32.mrf.mxu3  ;;  %v668_v12 = vsel %vm645_vm3, %v665_v30, %v667_v54 }
  0xfb   : > { %v1053_v16 = vadd.f32 %v986_v29, %v801_v5  ;;  %v1360_v13 = vpop.f32.mrf.mxu0 }
  0xfd   : > { %v4328_v18 = vadd.f32 %v1358_v43, %v1053_v16 }
 0x100   : > { %v736_v45 = vpop.f32.mrf.mxu2 }
 0x101   : > { %v802_v29 = vadd.f32 %v736_v45, %v577_v26  ;;  %v579_v63 = vpop.f32.mrf.mxu1  ;;  %v1275_v45 = vshrl.u32 %v4321_v46, 16 }
 0x102   : > { %v580_v5 = vadd.f32 %v579_v63, %v4242_v36  ;;  %v998_v26 = vpop.f32.mrf.mxu3 }
 0x103   : > { %v1054_v50 = vadd.f32 %v988_v52, %v802_v29  ;;  %v1363_v23 = vpop.f32.mrf.mxu0  ;;  %v3590_v52 = vld [vmem:[%s3977_s9 + $0x68] sm:$0xff]  ;;  %v669_v29 = vrot.slane %v4013_v31, 1  ;;  %v1277_v63 = vor.u32 %v1275_v45, %v1273_v24 }
 0x104   : > { %3235 = vmatmul.msk.bf16.gmra.mxu1 %vm403_vm2, %v4028_v38  ;;  %v1279_v38 = vshll.u32 %v4341_v48, 16 }
 0x105   : > { %3250 = vmatmul.msk.bf16.gmra.mxu2 %vm403_vm2, %v668_v12  ;;  %v4337_v43 = vadd.f32 %v1360_v13, %v1054_v50 }
 0x106   : > { %3388 = vmatmul.msk.bf16.gmra.mxu0 %vm403_vm2, %v1274_v8  ;;  %v1281_v12 = vrot.slane %v1279_v38, 1 }
 0x107   : > { %4815 = vst [vmem:[#allocation10_spill] sm:$0xff] %v4337_v43  ;;  %3323 = vmatmul.msk.bf16.gmra.mxu3 %vm403_vm2, %v3590_v52 }
 0x108   : > { %v739_v16 = vpop.f32.mrf.mxu2  ;;  %v1282_v52 = vsel %vm286_vm1, %v1277_v63, %v1281_v12 }
 0x109   : > { %v803_v30 = vadd.f32 %v739_v16, %v580_v5  ;;  %v581_v40 = vpop.f32.mrf.mxu1 }
 0x10a   : > { %v582_v11 = vadd.f32 %v581_v40, %v4259_v42  ;;  %v1001_v5 = vpop.f32.mrf.mxu3  ;;  %v670_v42 = vsel %vm645_vm3, %v667_v54, %v669_v29 }
 0x10b   : > { %v1055_v36 = vadd.f32 %v991_v51, %v803_v30  ;;  %v1365_v56 = vpop.f32.mrf.mxu0 }
 0x10d   : > { %v4348_v13 = vadd.f32 %v1363_v23, %v1055_v36  ;;  %v4361_v23 = vld [vmem:[%s3977_s9 + $0x70] sm:$0xff] }
 0x10f   : > { %4817 = vst [vmem:[#allocation12_spill] sm:$0xff] %v4348_v13 }
 0x110   : > { %v741_v50 = vpop.f32.mrf.mxu2 }
 0x111   : > { %v804_v51 = vadd.f32 %v741_v50, %v582_v11  ;;  %v584_v8 = vpop.f32.mrf.mxu1  ;;  %v3721_v50 = vld [vmem:[%s3977_s9 + $0x10] sm:$0xff]  }
 0x112   : > { %v585_v30 = vadd.f32 %v584_v8, %v4270_v58  ;;  %v3591_v58 = vld [vmem:[%s3977_s9 + $0x70] sm:$0xff]  ;;  %v671_v8 = vrot.slane %v4016_v32, 1 }
 0x113   : > { %v1056_v16 = vadd.f32 %v993_v57, %v804_v51  ;;  %v1368_v40 = vpop.f32.mrf.mxu0  ;;  %v1003_v57 = vpop.f32.mrf.mxu3 }
 0x114   : > { %3236 = vmatmul.msk.bf16.gmra.mxu1 %vm403_vm2, %v4066_v6  ;;  %v1283_v6 = vshrl.u32 %v4341_v48, 16  ;;  %v1995_v48 = vshrl.u32 %v3721_v50, 16 }
 0x115   : > { %3251 = vmatmul.msk.bf16.gmra.mxu2 %vm403_vm2, %v670_v42  ;;  %v4357_v24 = vadd.f32 %v1365_v56, %v1056_v16  ;;  %v1287_v56 = vshll.u32 %v4361_v23, 16  ;;  %v4373_v42 = vld [vmem:[%s3977_s9 + $0x18] sm:$0xff]  ;;  %v1997_v16 = vshll.u32 %v3721_v50, 16 }
 0x116   : > { %3389 = vmatmul.msk.bf16.gmra.mxu0 %vm403_vm2, %v1282_v52 }
 0x117   : > { %4818 = vst [vmem:[#allocation13_spill] sm:$0xff] %v4357_v24  ;;  %3324 = vmatmul.msk.bf16.gmra.mxu3 %vm403_vm2, %v3591_v58  ;;  %v1289_v52 = vrot.slane %v1287_v56, 1  ;;  %v672_v24 = vsel %vm645_vm3, %v669_v29, %v671_v8  ;;  %v1999_v13 = vrot.slane %v1997_v16, 1 }
 0x118   : > { %v744_v54 = vpop.f32.mrf.mxu2 }
 0x119   : > { %v805_v36 = vadd.f32 %v744_v54, %v585_v30  ;;  %v586_v11 = vpop.f32.mrf.mxu1  ;;  %v1285_v30 = vor.u32 %v1283_v6, %v1281_v12 }
 0x11a   : > { %v587_v38 = vadd.f32 %v586_v11, %v4285_v14  ;;  %v1107_v14 = vld [vmem:[%s3977_s9 + $0x78] sm:$0x1] }
 0x11b   : > { %v1057_v45 = vadd.f32 %v996_v22, %v805_v36  ;;  %v1370_v63 = vpop.f32.mrf.mxu0  ;;  %v4375_v54 = vpop.f32.mrf.mxu3  ;;  %v1167_v43 = vunpack.c.l.b16 %v1107_v14 }
 0x11d   : > { %v4369_v51 = vadd.f32 %v1368_v40, %v1057_v45  ;;  %v2002_v40 = vshll.u32 %v4373_v42, 16  ;;  %v4388_v56 = vpack.c.b16 %v1167_v43, %v1167_v43  ;;  %v4398_v43 = vld [vmem:[%s3977_s9 + $0x20] sm:$0xff] }
 0x11f   : > { %4819 = vst [vmem:[#allocation14_spill] sm:$0xff] %v4369_v51  ;;  %v1290_v51 = vsel %vm286_vm1, %v1285_v30, %v1289_v52  ;;  %v2004_v29 = vrot.slane %v2002_v40, 1 }
 0x120   : > { %v746_v22 = vpop.f32.mrf.mxu2 }
 0x121   : > { %v806_v36 = vadd.f32 %v746_v22, %v587_v38  ;;  %v589_v11 = vpop.f32.mrf.mxu1  ;;  %v2000_v38 = vor.u32 %v1999_v13, %v1995_v48 }
 0x122   : > { %v590_v6 = vadd.f32 %v589_v11, %v4181_v15  ;;  %v673_v15 = vrot.slane %v4052_v61, 1  ;;  %v2010_v61 = vshll.u32 %v4398_v43, 16 }
 0x123   : > { %v1058_v58 = vadd.f32 %v998_v26, %v806_v36  ;;  %v1373_v45 = vpop.f32.mrf.mxu0  ;;  %v1008_v50 = vpop.f32.mrf.mxu3  ;;  %v2005_v22 = vsel %vm286_vm1, %v2000_v38, %v2004_v29 }
 0x124   : > { %3237 = vmatmul.msk.bf16.gmra.mxu1 %vm403_vm2, %v4013_v31  ;;  %v674_v38 = vsel %vm645_vm3, %v671_v8, %v673_v15 }
 0x125   : > { %3252 = vmatmul.msk.bf16.gmra.mxu2 %vm403_vm2, %v672_v24  ;;  %v4384_v12 = vadd.f32 %v1370_v63, %v1058_v58  ;;  %v1291_v24 = vshrl.u32 %v4361_v23, 16  ;;  %v1295_v63 = vshll.u32 %v4388_v56, 16 }
 0x126   : > { %3390 = vmatmul.msk.bf16.gmra.mxu0 %vm403_vm2, %v1290_v51 }
 0x127   : > { %3531 = vmatmul.msk.bf16.vlgmr.msra.gmra.mxu3 %vm403_vm2, %v2005_v22  ;;  %v1293_v51 = vor.u32 %v1291_v24, %v1289_v52  ;;  %v1297_v36 = vrot.slane %v1295_v63, 1  ;;  %v3718_v22 = vld [vmem:[%s3977_s9 + $0x8] sm:$0xf0]  ;;  %v3722_v24 = vld [vmem:[%s3977_s9 + $0x10] sm:$0xf0] }
 0x128   : > { %v749_v26 = vpop.f32.mrf.mxu2  ;;  %v3723_v63 = vld [vmem:[%s3977_s9 + $0x10] sm:$0xe] }
 0x129   : > { %v807_v16 = vadd.f32 %v749_v26, %v590_v6  ;;  %v591_v30 = vpop.f32.mrf.mxu1 }
 0x12a   : > { %v592_v13 = vadd.f32 %v591_v30, %v4197_v0  ;;  %v1298_v0 = vsel %vm286_vm1, %v1293_v51, %v1297_v36 }
 0x12b   : > { %v1059_v31 = vadd.f32 %v1001_v5, %v807_v16  ;;  %v1375_v14 = vpop.f32.mrf.mxu0  ;;  %v1011_v40 = vpop.f32.mrf.mxu3  ;;  %v2012_v16 = vrot.slane %v2010_v61, 1 }
 0x12d   : > { %v4394_v48 = vadd.f32 %v1373_v45, %v1059_v31  ;;  %v2006_v45 = vshrl.u32 %v4373_v42, 16  ;;  %v3719_v31 = vld [vmem:[%s3977_s9 + $0x8] sm:$0xe] }
 0x12f   : > { %v2008_v8 = vor.u32 %v2006_v45, %v2004_v29  ;;  %v3724_v29 = vor.u32 %v3723_v63, %v3722_v24 }
 0x130   : > { %v751_v11 = vpop.f32.mrf.mxu2 }
 0x131   : > { %v808_v5 = vadd.f32 %v751_v11, %v592_v13  ;;  %v594_v58 = vpop.f32.mrf.mxu1  ;;  %v2268_v61 = vrot.slane %v3724_v29, 1 }
 0x132   : > { %v595_v30 = vadd.f32 %v594_v58, %v4209_v7  ;;  %v1458_v58 = vrot.slane %v4119_v62, 1 }
 0x133   : > { %v1060_v6 = vadd.f32 %v1003_v57, %v808_v5  ;;  %v1378_v26 = vpop.f32.mrf.mxu0  ;;  %v1013_v15 = vpop.f32.mrf.mxu3 }
 0x134   : > { %3238 = vmatmul.msk.bf16.gmra.mxu1 %vm403_vm2, %v4016_v32  ;;  %v3720_v32 = vor.u32 %v3719_v31, %v3718_v22 }
 0x135   : > { %3253 = vmatmul.msk.bf16.gmra.mxu2 %vm403_vm2, %v674_v38  ;;  %v4408_v52 = vadd.f32 %v1375_v14, %v1060_v6  ;;  %v2013_v14 = vsel %vm286_vm1, %v2008_v8, %v2012_v16  ;;  %v4423_v38 = vld [vmem:[%s3977_s9 + $0x28] sm:$0xff]  ;;  %v2269_v6 = vrot.slane %v4373_v42, 1 }
 0x136   : > { %3391 = vmatmul.msk.bf16.gmra.mxu0 %vm403_vm2, %v1298_v0  ;;  %v1457_v5 = vrot.slane %v3720_v32, 1 }
 0x137   : > { %3532 = vmatmul.msk.bf16.gmra.mxu3 %vm403_vm2, %v2013_v14  ;;  %v2270_v63 = vsel %vm645_vm3, %v2268_v61, %v2269_v6 }
 0x138   : > { %v754_v57 = vpop.f32.mrf.mxu2  ;;  %v1459_v31 = vsel %vm645_vm3, %v1457_v5, %v1458_v58 }
 0x139   : > { %v809_v13 = vadd.f32 %v754_v57, %v595_v30  ;;  %v596_v51 = vpop.f32.mrf.mxu1  ;;  %v2018_v57 = vshll.u32 %v4423_v38, 16 }
 0x13a   : > { %v597_v45 = vadd.f32 %v596_v51, %v4227_v25 }
 0x13b   : > { %v1061_v36 = vadd.f32 %v4375_v54, %v809_v13  ;;  %v1380_v11 = vpop.f32.mrf.mxu0  ;;  %v1016_v8 = vpop.f32.mrf.mxu3  ;;  %v3605_v54 = vld [vmem:[%s3977_s9 + $0x10] sm:$0xff]  ;;  %v2020_v13 = vrot.slane %v2018_v57, 1  ;;  %v2022_v57 = vshrl.u32 %v4423_v38, 16 }
 0x13d   : > { %v4419_v7 = vadd.f32 %v1378_v26, %v1061_v36  ;;  %v2014_v26 = vshrl.u32 %v4398_v43, 16 }
 0x13f   : > { %v2016_v42 = vor.u32 %v2014_v26, %v2012_v16 }
 0x140   : > { %v756_v0 = vpop.f32.mrf.mxu2 }
 0x141   : > { %v810_v30 = vadd.f32 %v756_v0, %v597_v45  ;;  %v599_v22 = vpop.f32.mrf.mxu1  ;;  %v2021_v29 = vsel %vm286_vm1, %v2016_v42, %v2020_v13  ;;  %v4444_v0 = vld [vmem:[%s3977_s9 + $0x30] sm:$0xff] }
 0x142   : > { %v600_v51 = vadd.f32 %v599_v22, %v4239_v35  ;;  %v2271_v35 = vrot.slane %v4398_v43, 1  ;;  %v2024_v43 = vor.u32 %v2022_v57, %v2020_v13  ;;  %v2030_v57 = vshrl.u32 %v4444_v0, 16 }
 0x143   : > { %v1062_v24 = vadd.f32 %v1008_v50, %v810_v30  ;;  %v1383_v62 = vpop.f32.mrf.mxu0  ;;  %v1018_v14 = vpop.f32.mrf.mxu3 }
 0x144   : > { %3393 = vmatmul.msk.bf16.vlgmr.msra.gmra.mxu1 %vm403_vm2, %v1459_v31  ;;  %v3606_v31 = vld [vmem:[%s3977_s9 + $0x18] sm:$0xff] }
 0x145   : > { %3464 = vmatmul.msk.bf16.vlgmr.msra.gmra.mxu2 %vm403_vm2, %v3605_v54  ;;  %v4434_v25 = vadd.f32 %v1380_v11, %v1062_v24  ;;  %v1460_v11 = vrot.slane %v4132_v17, 1  ;;  %v2026_v24 = vshll.u32 %v4444_v0, 16  ;;  %v2272_v17 = vsel %vm645_vm3, %v2269_v6, %v2271_v35 }
 0x146   : > { %3546 = vmatmul.msk.bf16.vlgmr.msra.gmra.mxu0 %vm403_vm2, %v2270_v63 }
 0x147   : > { %3533 = vmatmul.msk.bf16.gmra.mxu3 %vm403_vm2, %v2021_v29  ;;  %v2028_v42 = vrot.slane %v2026_v24, 1 }
 0x148   : > { %v759_v32 = vpop.f32.mrf.mxu2 }
 0x149   : > { %v811_v50 = vadd.f32 %v759_v32, %v600_v51  ;;  %v601_v36 = vpop.f32.mrf.mxu1  ;;  %v2029_v6 = vsel %vm286_vm1, %v2024_v43, %v2028_v42 }
 0x14a   : > { %v602_v16 = vadd.f32 %v601_v36, %v4257_v47 }
 0x14b   : > { %v1063_v5 = vadd.f32 %v1011_v40, %v811_v50  ;;  %v1385_v45 = vpop.f32.mrf.mxu0  ;;  %v1021_v54 = vpop.f32.mrf.mxu3  ;;  %v1461_v40 = vsel %vm645_vm3, %v1458_v58, %v1460_v11 }
 0x14d   : > { %v4440_v61 = vadd.f32 %v1383_v62, %v1063_v5 }
 0x150   : > { %v761_v30 = vpop.f32.mrf.mxu2 }
 0x151   : > { %v812_v22 = vadd.f32 %v761_v30, %v602_v16  ;;  %v604_v26 = vpop.f32.mrf.mxu1  ;;  %v4465_v16 = vld [vmem:[%s3977_s9 + $0x38] sm:$0xff] }
 0x152   : > { %v605_v58 = vadd.f32 %v604_v26, %v4267_v55  ;;  %v2273_v55 = vrot.slane %v4423_v38, 1  ;;  %v3607_v26 = vld [vmem:[%s3977_s9 + $0x20] sm:$0xff]  ;;  %v2034_v24 = vshll.u32 %v4465_v16, 16  ;;  %v2032_v38 = vor.u32 %v2030_v57, %v2028_v42 }
 0x153   : > { %v1064_v62 = vadd.f32 %v1013_v15, %v812_v22  ;;  %v1388_v63 = vpop.f32.mrf.mxu0  ;;  %v1023_v32 = vpop.f32.mrf.mxu3 }
 0x154   : > { %3394 = vmatmul.msk.bf16.gmra.mxu1 %vm403_vm2, %v1461_v40 }
 0x155   : > { %3465 = vmatmul.msk.bf16.gmra.mxu2 %vm403_vm2, %v3606_v31  ;;  %v4455_v47 = vadd.f32 %v1385_v45, %v1064_v62  ;;  %v1462_v45 = vrot.slane %v4146_v27, 1  ;;  %v2274_v27 = vsel %vm645_vm3, %v2271_v35, %v2273_v55 }
 0x156   : > { %3547 = vmatmul.msk.bf16.gmra.mxu0 %vm403_vm2, %v2272_v17  ;;  %v2036_v17 = vrot.slane %v2034_v24, 1 }
 0x157   : > { %3534 = vmatmul.msk.bf16.gmra.mxu3 %vm403_vm2, %v2029_v6 }
 0x158   : > { %v764_v51 = vpop.f32.mrf.mxu2  ;;  %v2037_v35 = vsel %vm286_vm1, %v2032_v38, %v2036_v17 }
 0x159   : > { %v813_v15 = vadd.f32 %v764_v51, %v605_v58  ;;  %v606_v50 = vpop.f32.mrf.mxu1 }
 0x15a   : > { %v607_v13 = vadd.f32 %v606_v50, %v4283_v2 }
 0x15b   : > { %v1065_v36 = vadd.f32 %v1016_v8, %v813_v15  ;;  %v1390_v29 = vpop.f32.mrf.mxu0  ;;  %v1026_v22 = vpop.f32.mrf.mxu3  ;;  %v1463_v8 = vsel %vm645_vm3, %v1460_v11, %v1462_v45 }
 0x15d   : > { %v4461_v5 = vadd.f32 %v1388_v63, %v1065_v36  ;;  %v1464_v36 = vrot.slane %v4160_v39, 1 }
 0x160   : > { %v766_v30 = vpop.f32.mrf.mxu2 }
 0x161   : > { %v814_v31 = vadd.f32 %v766_v30, %v607_v13  ;;  %v609_v40 = vpop.f32.mrf.mxu1 }
 0x162   : > { %v610_v11 = vadd.f32 %v609_v40, %v4194_v60  ;;  %v2275_v60 = vrot.slane %v4444_v0, 1 }
 0x163   : > { %v1066_v62 = vadd.f32 %v1018_v14, %v814_v31  ;;  %v1393_v63 = vpop.f32.mrf.mxu0  ;;  %v1028_v58 = vpop.f32.mrf.mxu3 }
 0x164   : > { %3395 = vmatmul.msk.bf16.gmra.mxu1 %vm403_vm2, %v1463_v8  ;;  %v2038_v8 = vshrl.u32 %v4465_v16, 16  ;;  %v2276_v39 = vsel %vm645_vm3, %v2273_v55, %v2275_v60 }
 0x165   : > { %3466 = vmatmul.msk.bf16.gmra.mxu2 %vm403_vm2, %v3607_v26  ;;  %v4476_v2 = vadd.f32 %v1390_v29, %v1066_v62  ;;  %v4486_v29 = vld [vmem:[%s3977_s9 + $0x40] sm:$0xff]  ;;  %v3608_v26 = vld [vmem:[%s3977_s9 + $0x28] sm:$0xff] }
 0x166   : > { %3548 = vmatmul.msk.bf16.gmra.mxu0 %vm403_vm2, %v2274_v27  ;;  %v2042_v57 = vshll.u32 %v4486_v29, 16  ;;  %v2040_v0 = vor.u32 %v2038_v8, %v2036_v17 }
 0x167   : > { %3535 = vmatmul.msk.bf16.gmra.mxu3 %vm403_vm2, %v2037_v35  ;;  %v1466_v35 = vrot.slane %v4174_v49, 1 }
 0x168   : > { %v769_v43 = vpop.f32.mrf.mxu2 }
 0x169   : > { %v815_v14 = vadd.f32 %v769_v43, %v610_v11  ;;  %v611_v51 = vpop.f32.mrf.mxu1 }
 0x16a   : > { %v612_v42 = vadd.f32 %v611_v51, %v4205_v3 }
 0x16b   : > { %v1067_v15 = vadd.f32 %v1021_v54, %v815_v14  ;;  %v1395_v50 = vpop.f32.mrf.mxu0  ;;  %v1031_v30 = vpop.f32.mrf.mxu3  ;;  %v1465_v54 = vsel %vm645_vm3, %v1462_v45, %v1464_v36 }
 0x16d   : > { %v4482_v6 = vadd.f32 %v1393_v63, %v1067_v15  ;;  %v2044_v63 = vrot.slane %v2042_v57, 1  ;;  %v4507_v15 = vld [vmem:[%s3977_s9 + $0x48] sm:$0xff] }
 0x16f   : > { %v2045_v55 = vsel %vm286_vm1, %v2040_v0, %v2044_v63 }
 0x170   : > { %v771_v13 = vpop.f32.mrf.mxu2 }
 0x171   : > { %v816_v31 = vadd.f32 %v771_v13, %v612_v42  ;;  %v614_v40 = vpop.f32.mrf.mxu1 }
 0x172   : > { %v615_v45 = vadd.f32 %v614_v40, %v4222_v20  ;;  %v2277_v20 = vrot.slane %v4465_v16, 1  ;;  %v2046_v40 = vshrl.u32 %v4486_v29, 16 }
 0x173   : > { %v1068_v24 = vadd.f32 %v1023_v32, %v816_v31  ;;  %v1398_v62 = vpop.f32.mrf.mxu0  ;;  %v1033_v38 = vpop.f32.mrf.mxu3  ;;  %v3609_v31 = vld [vmem:[%s3977_s9 + $0x30] sm:$0xff] }
 0x174   : > { %3396 = vmatmul.msk.bf16.gmra.mxu1 %vm403_vm2, %v1465_v54  ;;  %v2050_v54 = vshll.u32 %v4507_v15, 16  ;;  %v2278_v49 = vsel %vm645_vm3, %v2275_v60, %v2277_v20  ;;  %v2048_v16 = vor.u32 %v2046_v40, %v2044_v63 }
 0x175   : > { %3467 = vmatmul.msk.bf16.gmra.mxu2 %vm403_vm2, %v3608_v26  ;;  %v4497_v3 = vadd.f32 %v1395_v50, %v1068_v24 }
 0x176   : > { %3549 = vmatmul.msk.bf16.gmra.mxu0 %vm403_vm2, %v2276_v39  ;;  %v2052_v24 = vrot.slane %v2050_v54, 1 }
 0x177   : > { %3536 = vmatmul.msk.bf16.gmra.mxu3 %vm403_vm2, %v2045_v55  ;;  %v4528_v55 = vld [vmem:[%s3977_s9 + $0x50] sm:$0xff] }
 0x178   : > { %v774_v27 = vpop.f32.mrf.mxu2  ;;  %v2053_v60 = vsel %vm286_vm1, %v2048_v16, %v2052_v24 }
 0x179   : > { %v817_v32 = vadd.f32 %v774_v27, %v615_v45  ;;  %v616_v11 = vpop.f32.mrf.mxu1 }
 0x17a   : > { %v617_v17 = vadd.f32 %v616_v11, %v4235_v33  ;;  %v1468_v11 = vrot.slane %v4192_v59, 1 }
 0x17b   : > { %v1069_v43 = vadd.f32 %v1026_v22, %v817_v32  ;;  %v1400_v14 = vpop.f32.mrf.mxu0  ;;  %v1036_v42 = vpop.f32.mrf.mxu3  ;;  %v1467_v22 = vsel %vm645_vm3, %v1464_v36, %v1466_v35 }
 0x17d   : > { %v4503_v51 = vadd.f32 %v1398_v62, %v1069_v43 }
 0x180   : > { %v776_v50 = vpop.f32.mrf.mxu2 }
 0x181   : > { %v818_v13 = vadd.f32 %v776_v50, %v617_v17  ;;  %v619_v26 = vpop.f32.mrf.mxu1  ;;  %v3610_v50 = vld [vmem:[%s3977_s9 + $0x38] sm:$0xff] }
 0x182   : > { %v620_v36 = vadd.f32 %v619_v26, %v4252_v44  ;;  %v2279_v44 = vrot.slane %v4486_v29, 1  ;;  %v2058_v26 = vshll.u32 %v4528_v55, 16 }
 0x183   : > { %v1070_v8 = vadd.f32 %v1028_v58, %v818_v13  ;;  %v1403_v57 = vpop.f32.mrf.mxu0  ;;  %v1038_v39 = vpop.f32.mrf.mxu3 }
 0x184   : > { %3397 = vmatmul.msk.bf16.gmra.mxu1 %vm403_vm2, %v1467_v22  ;;  %v2280_v59 = vsel %vm645_vm3, %v2277_v20, %v2279_v44  ;;  %v2060_v54 = vrot.slane %v2058_v26, 1 }
 0x185   : > { %3468 = vmatmul.msk.bf16.gmra.mxu2 %vm403_vm2, %v3609_v31  ;;  %v4518_v33 = vadd.f32 %v1400_v14, %v1070_v8  ;;  %v2054_v31 = vshrl.u32 %v4507_v15, 16 }
 0x186   : > { %3550 = vmatmul.msk.bf16.gmra.mxu0 %vm403_vm2, %v2278_v49 }
 0x187   : > { %3537 = vmatmul.msk.bf16.gmra.mxu3 %vm403_vm2, %v2053_v60  ;;  %v2056_v29 = vor.u32 %v2054_v31, %v2052_v24 }
 0x188   : > { %v779_v62 = vpop.f32.mrf.mxu2 }
 0x189   : > { %v819_v58 = vadd.f32 %v779_v62, %v620_v36  ;;  %v621_v0 = vpop.f32.mrf.mxu1  ;;  %v2061_v20 = vsel %vm286_vm1, %v2056_v29, %v2060_v54 }
 0x18a   : > { %v622_v63 = vadd.f32 %v621_v0, %v4265_v53  ;;  %v4549_v0 = vld [vmem:[%s3977_s9 + $0x58] sm:$0xff] }
 0x18b   : > { %v1071_v45 = vadd.f32 %v1031_v30, %v819_v58  ;;  %v1405_v27 = vpop.f32.mrf.mxu0  ;;  %v1041_v14 = vpop.f32.mrf.mxu3  ;;  %v1469_v30 = vsel %vm645_vm3, %v1466_v35, %v1468_v11  ;;  %v1470_v58 = vrot.slane %v4220_v19, 1 }
 0x18d   : > { %v4524_v32 = vadd.f32 %v1403_v57, %v1071_v45 }
 0x190   : > { %v781_v43 = vpop.f32.mrf.mxu2 }
 0x191   : > { %v820_v17 = vadd.f32 %v781_v43, %v622_v63  ;;  %v624_v13 = vpop.f32.mrf.mxu1  ;;  %v3611_v63 = vld [vmem:[%s3977_s9 + $0x40] sm:$0xff] }
 0x192   : > { %v625_v35 = vadd.f32 %v624_v13, %v4280_v1  ;;  %v2281_v1 = vrot.slane %v4507_v15, 1 }
 0x193   : > { %v1072_v22 = vadd.f32 %v1033_v38, %v820_v17  ;;  %v1408_v40 = vpop.f32.mrf.mxu0  ;;  %v1043_v57 = vpop.f32.mrf.mxu3  ;;  %v2062_v17 = vshrl.u32 %v4528_v55, 16 }
 0x194   : > { %3398 = vmatmul.msk.bf16.gmra.mxu1 %vm403_vm2, %v1469_v30  ;;  %v2282_v19 = vsel %vm645_vm3, %v2279_v44, %v2281_v1 }
 0x195   : > { %3469 = vmatmul.msk.bf16.gmra.mxu2 %vm403_vm2, %v3610_v50  ;;  %v4539_v53 = vadd.f32 %v1405_v27, %v1072_v22  ;;  %v2066_v50 = vshll.u32 %v4549_v0, 16  ;;  %v2064_v15 = vor.u32 %v2062_v17, %v2060_v54 }
 0x196   : > { %3551 = vmatmul.msk.bf16.gmra.mxu0 %vm403_vm2, %v2280_v59 }
 0x197   : > { %3538 = vmatmul.msk.bf16.gmra.mxu3 %vm403_vm2, %v2061_v20  ;;  %v2068_v31 = vrot.slane %v2066_v50, 1 }
 0x198   : > { %v784_v8 = vpop.f32.mrf.mxu2 }
 0x199   : > { %v821_v38 = vadd.f32 %v784_v8, %v625_v35  ;;  %v626_v49 = vpop.f32.mrf.mxu1  ;;  %v2069_v44 = vsel %vm286_vm1, %v2064_v15, %v2068_v31  ;;  %v1472_v8 = vrot.slane %v4250_v41, 1 }
 0x19a   : > { %v627_v24 = vadd.f32 %v626_v49, %v4291_v28 }
 0x19b   : > { %v1073_v16 = vadd.f32 %v1036_v42, %v821_v38  ;;  %v1410_v36 = vpop.f32.mrf.mxu0  ;;  %v1046_v45 = vpop.f32.mrf.mxu3  ;;  %v1471_v42 = vsel %vm645_vm3, %v1468_v11, %v1470_v58  ;;  %v4570_v38 = vld [vmem:[%s3977_s9 + $0x60] sm:$0xff] }
 0x19d   : > { %v4545_v62 = vadd.f32 %v1408_v40, %v1073_v16 }
 0x1a0   : > { %v786_v60 = vpop.f32.mrf.mxu2 }
 0x1a1   : > { %v822_v27 = vadd.f32 %v786_v60, %v627_v24  ;;  %v629_v43 = vpop.f32.mrf.mxu1  ;;  %v2070_v60 = vshrl.u32 %v4549_v0, 16 }
 0x1a2   : > { %v630_v11 = vadd.f32 %v629_v43, %v4207_v4  ;;  %v2283_v4 = vrot.slane %v4528_v55, 1 }
 0x1a3   : > { %v1074_v13 = vadd.f32 %v1038_v39, %v822_v27  ;;  %v1413_v30 = vpop.f32.mrf.mxu0  ;;  %v1048_v22 = vpop.f32.mrf.mxu3  ;;  %v2074_v27 = vshll.u32 %v4570_v38, 16  ;;  %v2072_v55 = vor.u32 %v2070_v60, %v2068_v31  ;;  %v4821_v31 = vld [vmem:[#allocation8_spill] sm:$0xff] }
 0x1a4   : > { %3399 = vmatmul.msk.bf16.gmra.mxu1 %vm403_vm2, %v1471_v42  ;;  %v2284_v43 = vsel %vm645_vm3, %v2281_v1, %v2283_v4 }
 0x1a5   : > { %3470 = vmatmul.msk.bf16.gmra.mxu2 %vm403_vm2, %v3611_v63  ;;  %v4560_v28 = vadd.f32 %v1410_v36, %v1074_v13  ;;  %v3612_v36 = vld [vmem:[%s3977_s9 + $0x48] sm:$0xff]  ;;  %v2076_v42 = vrot.slane %v2074_v27, 1  ;;  %v2505_v27 = vlaneseq }
 0x1a6   : > { %3552 = vmatmul.msk.bf16.gmra.mxu0 %vm403_vm2, %v2282_v19 }
 0x1a7   : > { %3539 = vmatmul.msk.bf16.gmra.mxu3 %vm403_vm2, %v2069_v44  ;;  %v2077_v1 = vsel %vm286_vm1, %v2072_v55, %v2076_v42 }
 0x1a8   : > { %v789_v26 = vpop.f32.mrf.mxu2 }
 0x1a9   : > { %v823_v39 = vadd.f32 %v789_v26, %v630_v11  ;;  %v631_v40 = vpop.f32.mrf.mxu1  ;;  %v4820_v11 = vld [vmem:[#allocation9_spill] sm:$0xff] }
 0x1aa   : > { %v632_v54 = vadd.f32 %v631_v40, %v4224_v21  ;;  %v1474_v26 = vrot.slane %v4820_v11, 1 }
 0x1ab   : > { %v1075_v59 = vadd.f32 %v1041_v14, %v823_v39  ;;  %v1415_v29 = vpop.f32.mrf.mxu0  ;;  %v4574_v20 = vpop.f32.mrf.mxu3  ;;  %v1473_v14 = vsel %vm645_vm3, %v1470_v58, %v1472_v8  ;;  %v4593_v39 = vld [vmem:[%s3977_s9 + $0x68] sm:$0xff] }
 0x1ad   : > { %v4566_v35 = vadd.f32 %v1413_v30, %v1075_v59 }
 0x1b0   : > { %v791_v49 = vpop.f32.mrf.mxu2 }
 0x1b1   : > { %v824_v16 = vadd.f32 %v791_v49, %v632_v54  ;;  %v634_v24 = vpop.f32.mrf.mxu1  ;;  %v3613_v54 = vld [vmem:[%s3977_s9 + $0x50] sm:$0xff] }
 0x1b2   : > { %v635_v58 = vadd.f32 %v634_v24, %v4237_v34  ;;  %v2285_v34 = vrot.slane %v4549_v0, 1 }
 0x1b3   : > { %v1076_v63 = vadd.f32 %v1043_v57, %v824_v16  ;;  %v1418_v41 = vpop.f32.mrf.mxu0  ;;  %v2166_v50 = vpop.f32.mrf.mxu3  ;;  %v2078_v16 = vshrl.u32 %v4570_v38, 16 }
 0x1b4   : > { %3400 = vmatmul.msk.bf16.gmra.mxu1 %vm403_vm2, %v1473_v14  ;;  %v2286_v60 = vsel %vm645_vm3, %v2283_v4, %v2285_v34 }
 0x1b5   : > { %3471 = vmatmul.msk.bf16.gmra.mxu2 %vm403_vm2, %v3612_v36  ;;  %v4583_v21 = vadd.f32 %v1415_v29, %v1076_v63  ;;  %v2082_v36 = vshll.u32 %v4593_v39, 16 }
 0x1b6   : > { %3553 = vmatmul.msk.bf16.gmra.mxu0 %vm403_vm2, %v2284_v43  ;;  %v4609_v43 = vshrl.u32 %v2505_v27, 7 }
 0x1b7   : > { %3540 = vmatmul.msk.bf16.gmra.mxu3 %vm403_vm2, %v2077_v1  ;;  %v2084_v63 = vrot.slane %v2082_v36, 1  ;;  %v4619_v1 = vld [vmem:[%s3977_s9 + $0x70] sm:$0xff] }
 0x1b8   : > { %v794_v17 = vpop.f32.mrf.mxu2 }
 0x1b9   : > { %v825_v57 = vadd.f32 %v794_v17, %v635_v58  ;;  %v636_v13 = vpop.f32.mrf.mxu1 }
 0x1ba   : > { %v637_v40 = vadd.f32 %v636_v13, %v4821_v31  ;;  %v2507_v13 = vadd.s32 8, %v4609_v43 }
 0x1bb   : > { %v1077_v30 = vadd.f32 %v1046_v45, %v825_v57  ;;  %v1420_v19 = vpop.f32.mrf.mxu0  ;;  %v4597_v59 = vpop.f32.mrf.mxu3  ;;  %v1475_v45 = vsel %vm645_vm3, %v1472_v8, %v1474_v26  ;;  %v2080_v8 = vor.u32 %v2078_v16, %v2076_v42  ;;  %v1476_v42 = vrot.slane %v4301_v37, 1 }
 0x1bc   : > { %v2545_v31 = vand.u32 15, %v2507_v13  ;;  %v2509_v13 = vadd.s32 24, %v4609_v43 }
 0x1bd   : > { %v4589_v15 = vadd.f32 %v1418_v41, %v1077_v30  ;;  %v2085_v58 = vsel %vm286_vm1, %v2080_v8, %v2084_v63  ;;  %v1477_v37 = vsel %vm645_vm3, %v1474_v26, %v1476_v42 }
 0x1be   : > { %vm2871_vm4 = vcmp.lt.s32.totalorder %v2545_v31, 14 }
 0x1c0   : > { %v796_v44 = vpop.f32.mrf.mxu2 }
 0x1c1   : > { %v826_v29 = vadd.f32 %v796_v44, %v637_v40  ;;  %v1540_v49 = vpop.f32.mrf.mxu1 }
 0x1c2   : > { %v1610_v4 = vadd.f32 %v1540_v49, %v4308_v10  ;;  %v2287_v10 = vrot.slane %v4570_v38, 1  ;;  %v2086_v49 = vshrl.u32 %v4593_v39, 16 }
 0x1c3   : > { %v1078_v24 = vadd.f32 %v1048_v22, %v826_v29  ;;  %v2351_v14 = vpop.f32.mrf.mxu0  ;;  %v4611_v22 = vpop.f32.mrf.mxu3  ;;  %v3614_v29 = vld [vmem:[%s3977_s9 + $0x58] sm:$0xff] }
 0x1c4   : > { %3401 = vmatmul.msk.bf16.gmra.mxu1 %vm403_vm2, %v1475_v45  ;;  %v2288_v38 = vsel %vm645_vm3, %v2285_v34, %v2287_v10 }
 0x1c5   : > { %3472 = vmatmul.msk.bf16.gmra.mxu2 %vm403_vm2, %v3613_v54  ;;  %v4606_v0 = vadd.f32 %v1420_v19, %v1078_v24  ;;  %v2088_v24 = vor.u32 %v2086_v49, %v2084_v63 }
 0x1c6   : > { %3554 = vmatmul.msk.bf16.gmra.mxu0 %vm403_vm2, %v2286_v60 }
 0x1c7   : > { %3541 = vmatmul.msk.bf16.gmra.mxu3 %vm403_vm2, %v2085_v58 }
 0x1c8   : > { %v1792_v41 = vpop.f32.mrf.mxu2 }
 0x1c9   : > { %v1542_v55 = vpop.f32.mrf.mxu1  ;;  %v1862_v57 = vadd.f32 %v1792_v41, %v1610_v4 }
 0x1ca   : > { %v1611_v30 = vadd.f32 %v1542_v55, %v4317_v9  ;;  %v2090_v9 = vshll.u32 %v4619_v1, 16 }
 0x1cb   : > { %v2353_v17 = vpop.f32.mrf.mxu0  ;;  %v2234_v19 = vadd.f32 %v4574_v20, %v1862_v57  ;;  %v4627_v40 = vpop.f32.mrf.mxu3 }
 0x1cc   : > { %v2092_v60 = vrot.slane %v2090_v9, 1  ;;  %v2559_v9 = vand.u32 15, %v2509_v13 }
 0x1cd   : > { %v2421_v36 = vadd.f32 %v2351_v14, %v2234_v19  ;;  %v1478_v19 = vrot.slane %v4321_v46, 1  ;;  %v2094_v46 = vshrl.u32 %v4619_v1, 16 }
 0x1ce   : > { %v2093_v63 = vsel %vm286_vm1, %v2088_v24, %v2092_v60  ;;  %vm2873_vm5 = vcmp.lt.s32.totalorder %v2559_v9, 14 }
 0x1cf   : > { %v2960_v41 = vmul.f32 %v2421_v36, %v2421_v36 }
 0x1d0   : > { %v1794_v11 = vpop.f32.mrf.mxu2 }
 0x1d1   : > { %v1863_v44 = vadd.f32 %v1794_v11, %v1611_v30  ;;  %v1545_v54 = vpop.f32.mrf.mxu1  ;;  %v4650_v11 = vld [vmem:[%s3977_s9 + $0x78] sm:$0xff] }
 0x1d2   : > { %v1612_v8 = vadd.f32 %v1545_v54, %v4328_v18  ;;  %v2098_v24 = vshll.u32 %v4650_v11, 16 }
 0x1d3   : > { %v2235_v45 = vadd.f32 %v2166_v50, %v1863_v44  ;;  %v2356_v16 = vpop.f32.mrf.mxu0  ;;  %v4639_v14 = vpop.f32.mrf.mxu3 }
 0x1d4   : > { %3402 = vmatmul.msk.bf16.gmra.mxu1 %vm403_vm2, %v1477_v37  ;;  %v2289_v37 = vrot.slane %v4593_v39, 1 }
 0x1d5   : > { %v2422_v20 = vadd.f32 %v2353_v17, %v2235_v45  ;;  %3473 = vmatmul.msk.bf16.gmra.mxu2 %vm403_vm2, %v3614_v29  ;;  %v4822_v29 = vld [vmem:[#allocation10_spill] sm:$0xff] }
 0x1d6   : > { %3555 = vmatmul.msk.bf16.gmra.mxu0 %vm403_vm2, %v2288_v38  ;;  %v2290_v39 = vsel %vm645_vm3, %v2287_v10, %v2289_v37 }
 0x1d7   : > { %v3647_v26 = vpack.c.bf16 %v2422_v20, %v2421_v36  ;;  %v2899_v27 = vsel %vm2871_vm4, %v2422_v20, 0.0  ;;  %3542 = vmatmul.msk.bf16.gmra.mxu3 %vm403_vm2, %v2093_v63  ;;  %v1479_v20 = vsel %vm645_vm3, %v1476_v42, %v1478_v19  ;;  %v2096_v42 = vor.u32 %v2094_v46, %v2092_v60 }
 0x1d8   : > { %v2926_v50 = vadd.f32 %v2899_v27, %v2421_v36  ;;  %v2961_v4 = vmul.f32 %v2899_v27, %v2899_v27  ;;  %v1797_v34 = vpop.f32.mrf.mxu2  ;;  %v3615_v36 = vld [vmem:[%s3977_s9 + $0x60] sm:$0xff]  ;;  %v2291_v46 = vrot.slane %v4619_v1, 1 }
 0x1d9   : > { %3648 = vst [vmem:[%s4641_s4] sm:$0xff] %v3647_v26   ;;  %v1864_v55 = vadd.f32 %v1797_v34, %v1612_v8  ;;  %v1547_v17 = vpop.f32.mrf.mxu1  ;;  %v4823_v34 = vld [vmem:[#allocation12_spill] sm:$0xff] }
 0x1da   : > { %v2988_v58 = vadd.f32 %v2961_v4, %v2960_v41  ;;  %v1613_v54 = vadd.f32 %v1547_v17, %v4822_v29  ;;  %v2100_v41 = vrot.slane %v2098_v24, 1  ;;  %v2292_v1 = vsel %vm645_vm3, %v2289_v37, %v2291_v46 }
 0x1db   : > { %v2236_v57 = vadd.f32 %v4597_v59, %v1864_v55  ;;  %v2358_v18 = vpop.f32.mrf.mxu0  ;;  %v4654_v59 = vpop.f32.mrf.mxu3 }
 0x1dd   : > { %v2423_v30 = vadd.f32 %v2356_v16, %v2236_v57 }
 0x1df   : > { %v2927_v31 = vadd.f32 %v2926_v50, %v2423_v30  ;;  %v2962_v44 = vmul.f32 %v2423_v30, %v2423_v30 }
 0x1e0   : > { %v1799_v49 = vpop.f32.mrf.mxu2 }
 0x1e1   : > { %v2989_v45 = vadd.f32 %v2988_v58, %v2962_v44  ;;  %v1865_v38 = vadd.f32 %v1799_v49, %v1613_v54  ;;  %v1550_v16 = vpop.f32.mrf.mxu1  ;;  %v1918_v58 = vld [vmem:[%s3977_s9 + $0x80] sm:$0x1]  ;;  %v2101_v44 = vsel %vm286_vm1, %v2096_v42, %v2100_v41  ;;  %v2511_v54 = vadd.s32 40, %v4609_v43  ;;  %v3616_v42 = vld [vmem:[%s3977_s9 + $0x68] sm:$0xff] }
 0x1e2   : > { %v1614_v55 = vadd.f32 %v1550_v16, %v4823_v34  ;;  %v1978_v29 = vunpack.c.l.b16 %v1918_v58 }
 0x1e3   : > { %v2237_v26 = vadd.f32 %v4611_v22, %v1865_v38  ;;  %v2361_v27 = vpop.f32.mrf.mxu0  ;;  %v4667_v10 = vpop.f32.mrf.mxu3 }
 0x1e4   : > { %3403 = vmatmul.msk.bf16.gmra.mxu1 %vm403_vm2, %v1479_v20  ;;  %v4675_v38 = vpack.c.b16 %v1978_v29, %v1978_v29 }
 0x1e5   : > { %v2424_v8 = vadd.f32 %v2358_v18, %v2237_v26  ;;  %3474 = vmatmul.msk.bf16.gmra.mxu2 %vm403_vm2, %v3615_v36  ;;  %v2573_v26 = vand.u32 15, %v2511_v54 }
 0x1e6   : > { %3556 = vmatmul.msk.bf16.gmra.mxu0 %vm403_vm2, %v2290_v39  ;;  %v2106_v34 = vshll.u32 %v4675_v38, 16 }
 0x1e7   : > { %v3652_v50 = vpack.c.bf16 %v2424_v8, %v2423_v30  ;;  %v2901_v4 = vsel %vm2873_vm5, %v2424_v8, 0.0  ;;  %3543 = vmatmul.msk.bf16.gmra.mxu3 %vm403_vm2, %v2101_v44  ;;  %vm2875_vm6 = vcmp.lt.s32.totalorder %v2573_v26, 14 }
 0x1e8   : > { %v2928_v22 = vadd.f32 %v2927_v31, %v2901_v4  ;;  %v2963_v17 = vmul.f32 %v2901_v4, %v2901_v4  ;;  %v1802_v63 = vpop.f32.mrf.mxu2  ;;  %v4824_v31 = vld [vmem:[#allocation11_spill] sm:$0xff]  ;;  %v2102_v4 = vshrl.u32 %v4650_v11, 16 }
 0x1e9   : > { %3725 = vst [vmem:[%s4641_s4 + $0x8] sm:$0xff] %v3652_v50   ;;  %v1866_v57 = vadd.f32 %v1802_v63, %v1614_v55  ;;  %v1552_v13 = vpop.f32.mrf.mxu1  ;;  %v1480_v9 = vrot.slane %v4824_v31, 1 }
 0x1ea   : > { %v2990_v18 = vadd.f32 %v2989_v45, %v2963_v17  ;;  %v4825_v45 = vld [vmem:[#allocation13_spill] sm:$0xff]  ;;  %v2104_v17 = vor.u32 %v2102_v4, %v2100_v41  ;;  %v2513_v41 = vadd.s32 56, %v4609_v43 }
 0x1eb   : > { %v2238_v60 = vadd.f32 %v4627_v40, %v1866_v57  ;;  %v2363_v30 = vpop.f32.mrf.mxu0  ;;  %v1615_v20 = vadd.f32 %v1552_v13, %v4825_v45  ;;  %v4679_v40 = vpop.f32.mrf.mxu3  ;;  %v1481_v50 = vsel %vm645_vm3, %v1478_v19, %v1480_v9  ;;  %v2108_v19 = vrot.slane %v2106_v34, 1 }
 0x1ed   : > { %v2425_v49 = vadd.f32 %v2361_v27, %v2238_v60  ;;  %v2109_v31 = vsel %vm286_vm1, %v2104_v17, %v2108_v19 }
 0x1ef   : > { %v2929_v36 = vadd.f32 %v2928_v22, %v2425_v49  ;;  %v2964_v16 = vmul.f32 %v2425_v49, %v2425_v49 }
 0x1f0   : > { %v1804_v24 = vpop.f32.mrf.mxu2 }
 0x1f1   : > { %v2991_v39 = vadd.f32 %v2990_v18, %v2964_v16  ;;  %v1867_v8 = vadd.f32 %v1804_v24, %v1615_v20  ;;  %v1555_v27 = vpop.f32.mrf.mxu1  ;;  %v4826_v18 = vld [vmem:[#allocation14_spill] sm:$0xff] }
 0x1f2   : > { %v1616_v13 = vadd.f32 %v1555_v27, %v4826_v18 }
 0x1f3   : > { %v2239_v55 = vadd.f32 %v4639_v14, %v1867_v8  ;;  %v2366_v58 = vpop.f32.mrf.mxu0  ;;  %v2186_v60 = vpop.f32.mrf.mxu3 }
 0x1f4   : > { %3404 = vmatmul.msk.bf16.gmra.mxu1 %vm403_vm2, %v1481_v50 }
 0x1f5   : > { %v2426_v22 = vadd.f32 %v2363_v30, %v2239_v55  ;;  %3475 = vmatmul.msk.bf16.gmra.mxu2 %vm403_vm2, %v3616_v42  ;;  %v2587_v42 = vand.u32 15, %v2513_v41 }
 0x1f6   : > { %3557 = vmatmul.msk.bf16.gmra.mxu0 %vm403_vm2, %v2292_v1 }
 0x1f7   : > { %v3657_v63 = vpack.c.bf16 %v2426_v22, %v2425_v49  ;;  %v2903_v57 = vsel %vm2875_vm6, %v2426_v22, 0.0  ;;  %3544 = vmatmul.msk.bf16.gmra.mxu3 %vm403_vm2, %v2109_v31  ;;  %vm2877_vm7 = vcmp.lt.s32.totalorder %v2587_v42, 14  ;;  %v2295_v31 = vrot.slane %v4675_v38, 1 }
 0x1f8   : > { %v2930_v44 = vadd.f32 %v2929_v36, %v2903_v57  ;;  %v2965_v14 = vmul.f32 %v2903_v57, %v2903_v57  ;;  %v1807_v29 = vpop.f32.mrf.mxu2  ;;  %v1482_v36 = vrot.slane %v4361_v23, 1 }
 0x1f9   : > { %3726 = vst [vmem:[%s4641_s4 + $0x10] sm:$0xff] %v3657_v63   ;;  %v1868_v37 = vadd.f32 %v1807_v29, %v1616_v13  ;;  %v1557_v30 = vpop.f32.mrf.mxu1 }
 0x1fa   : > { %v2992_v54 = vadd.f32 %v2991_v39, %v2965_v14  ;;  %v1617_v26 = vadd.f32 %v1557_v30, %v4384_v12  ;;  %v2293_v39 = vrot.slane %v4650_v11, 1  ;;  %v1483_v55 = vsel %vm645_vm3, %v1480_v9, %v1482_v36 }
 0x1fb   : > { %v2240_v16 = vadd.f32 %v4654_v59, %v1868_v37  ;;  %v2368_v45 = vpop.f32.mrf.mxu0  ;;  %v2189_v27 = vpop.f32.mrf.mxu3  ;;  %v3617_v59 = vld [vmem:[%s3977_s9 + $0x70] sm:$0xff]  ;;  %v2515_v14 = vadd.s32 72, %v4609_v43  ;;  %v1484_v37 = vrot.slane %v4388_v56, 1 }
 0x1fc   : > { %v2294_v23 = vsel %vm645_vm3, %v2291_v46, %v2293_v39  ;;  %v2296_v56 = vsel %vm645_vm3, %v2293_v39, %v2295_v31 }
 0x1fd   : > { %v2427_v49 = vadd.f32 %v2366_v58, %v2240_v16 }
 0x1ff   : > { %v2931_v20 = vadd.f32 %v2930_v44, %v2427_v49  ;;  %v2966_v24 = vmul.f32 %v2427_v49, %v2427_v49 }
 0x200   : > { %v1809_v8 = vpop.f32.mrf.mxu2 }
 0x201   : > { %v2993_v50 = vadd.f32 %v2992_v54, %v2966_v24  ;;  %v1869_v4 = vadd.f32 %v1809_v8, %v1617_v26  ;;  %v1560_v34 = vpop.f32.mrf.mxu1  ;;  %v3618_v24 = vld [vmem:[%s3977_s9 + $0x78] sm:$0xff]  ;;  %s3040_s9 = sshll.u32 %s4641_s4, 4  ;;  %s3041_s9 = int_to_ptr.vmem [resolvable:$true] %s3040_s9 }
 0x202   : > { %v1618_v17 = vadd.f32 %v1560_v34, %v4394_v48 }
 0x203   : > { %v2241_v58 = vadd.f32 %v4667_v10, %v1869_v4  ;;  %v2371_v1 = vpop.f32.mrf.mxu0  ;;  %v2191_v57 = vpop.f32.mrf.mxu3 }
 0x204   : > { %3405 = vmatmul.msk.bf16.gmra.mxu1 %vm403_vm2, %v1483_v55 }
 0x205   : > { %v2428_v22 = vadd.f32 %v2368_v45, %v2241_v58  ;;  %3476 = vmatmul.msk.bf16.gmra.mxu2 %vm403_vm2, %v3617_v59  ;;  %v2601_v45 = vand.u32 15, %v2515_v14 }
 0x206   : > { %3558 = vmatmul.msk.bf16.gmra.mxu0 %vm403_vm2, %v2294_v23 }
 0x207   : > { %v3662_v12 = vpack.c.bf16 %v2428_v22, %v2427_v49  ;;  %v2905_v11 = vsel %vm2877_vm7, %v2428_v22, 0.0  ;;  %vm2879_vm8 = vcmp.lt.s32.totalorder %v2601_v45, 14  ;;  %v2517_v22 = vadd.s32 88, %v4609_v43 }
 0x208   : > { %v2932_v19 = vadd.f32 %v2931_v20, %v2905_v11  ;;  %v2967_v9 = vmul.f32 %v2905_v11, %v2905_v11  ;;  %v1812_v63 = vpop.f32.mrf.mxu2 }
 0x209   : > { %3727 = vst [vmem:[%s4641_s4 + $0x18] sm:$0xff] %v3662_v12   ;;  %v1870_v10 = vadd.f32 %v1812_v63, %v1618_v17  ;;  %v1562_v46 = vpop.f32.mrf.mxu1 }
 0x20a   : > { %v2994_v18 = vadd.f32 %v2993_v50, %v2967_v9  ;;  %v1619_v48 = vadd.f32 %v1562_v46, %v4408_v52 }
 0x20b   : > { %v2242_v13 = vadd.f32 %v4679_v40, %v1870_v10  ;;  %v2373_v44 = vpop.f32.mrf.mxu0  ;;  %v2194_v41 = vpop.f32.mrf.mxu3  ;;  %v1485_v40 = vsel %vm645_vm3, %v1482_v36, %v1484_v37 }
 0x20d   : > { %v2429_v29 = vadd.f32 %v2371_v1, %v2242_v13 }
 0x20f   : > { %v2933_v54 = vadd.f32 %v2932_v19, %v2429_v29  ;;  %v2968_v30 = vmul.f32 %v2429_v29, %v2429_v29 }
 0x210   : > { %v1814_v16 = vpop.f32.mrf.mxu2 }
 0x211   : > { %v2995_v49 = vadd.f32 %v2994_v18, %v2968_v30  ;;  %v1871_v20 = vadd.f32 %v1814_v16, %v1619_v48  ;;  %v1565_v26 = vpop.f32.mrf.mxu1 }
 0x212   : > { %v1620_v4 = vadd.f32 %v1565_v26, %v4419_v7  ;;  %v2615_v7 = vand.u32 15, %v2517_v22 }
 0x213   : > { %v2243_v8 = vadd.f32 %v2186_v60, %v1871_v20  ;;  %v2376_v42 = vpop.f32.mrf.mxu0  ;;  %v2196_v55 = vpop.f32.mrf.mxu3 }
 0x214   : > { %3406 = vmatmul.msk.bf16.gmra.mxu1 %vm403_vm2, %v1485_v40  ;;  %vm2881_vm9 = vcmp.lt.s32.totalorder %v2615_v7, 14 }
 0x215   : > { %v2430_v50 = vadd.f32 %v2373_v44, %v2243_v8  ;;  %3477 = vmatmul.msk.bf16.gmra.mxu2 %vm403_vm2, %v3618_v24  ;;  %v2519_v24 = vadd.s32 104, %v4609_v43 }
 0x216   : > { %3559 = vmatmul.msk.bf16.gmra.mxu0 %vm403_vm2, %v2296_v56 }
 0x217   : > { %v3667_v52 = vpack.c.bf16 %v2430_v50, %v2429_v29  ;;  %v2907_v38 = vsel %vm2879_vm8, %v2430_v50, 0.0 }
 0x218   : > { %v2934_v59 = vadd.f32 %v2933_v54, %v2907_v38  ;;  %v2969_v34 = vmul.f32 %v2907_v38, %v2907_v38  ;;  %v1817_v36 = vpop.f32.mrf.mxu2 }
 0x219   : > { %3728 = vst [vmem:[%s4641_s4 + $0x20] sm:$0xff] %v3667_v52   ;;  %v1872_v60 = vadd.f32 %v1817_v36, %v1620_v4  ;;  %v1567_v39 = vpop.f32.mrf.mxu1 }
 0x21a   : > { %v2996_v58 = vadd.f32 %v2995_v49, %v2969_v34  ;;  %v1621_v19 = vadd.f32 %v1567_v39, %v4434_v25 }
 0x21b   : > { %v2244_v1 = vadd.f32 %v2189_v27, %v1872_v60  ;;  %v2378_v23 = vpop.f32.mrf.mxu0  ;;  %v2199_v63 = vpop.f32.mrf.mxu3 }
 0x21d   : > { %v2431_v12 = vadd.f32 %v2376_v42, %v2244_v1 }
 0x21f   : > { %v2935_v11 = vadd.f32 %v2934_v59, %v2431_v12  ;;  %v2970_v17 = vmul.f32 %v2431_v12, %v2431_v12 }
 0x220   : > { %v1819_v9 = vpop.f32.mrf.mxu2 }
 0x221   : > { %v2997_v10 = vadd.f32 %v2996_v58, %v2970_v17  ;;  %v1873_v18 = vadd.f32 %v1819_v9, %v1621_v19  ;;  %v1570_v46 = vpop.f32.mrf.mxu1  ;;  %v2521_v17 = vadd.s32 120, %v4609_v43 }
 0x222   : > { %v1622_v37 = vadd.f32 %v1570_v46, %v4440_v61  ;;  %v2629_v61 = vand.u32 15, %v2519_v24 }
 0x223   : > { %v2245_v13 = vadd.f32 %v2191_v57, %v1873_v18  ;;  %v2381_v44 = vpop.f32.mrf.mxu0  ;;  %v2201_v45 = vpop.f32.mrf.mxu3 }
 0x224   : > { %vm2883_vm10 = vcmp.lt.s32.totalorder %v2629_v61, 14 }
 0x225   : > { %v2432_v14 = vadd.f32 %v2378_v23, %v2245_v13 }
 0x227   : > { %v3672_v27 = vpack.c.bf16 %v2432_v14, %v2431_v12  ;;  %v2909_v29 = vsel %vm2881_vm9, %v2432_v14, 0.0 }
 0x228   : > { %v2936_v54 = vadd.f32 %v2935_v11, %v2909_v29  ;;  %v2971_v30 = vmul.f32 %v2909_v29, %v2909_v29  ;;  %v1822_v48 = vpop.f32.mrf.mxu2 }
 0x229   : > { %3729 = vst [vmem:[%s4641_s4 + $0x28] sm:$0xff] %v3672_v27   ;;  %v1874_v25 = vadd.f32 %v1822_v48, %v1622_v37  ;;  %v1572_v16 = vpop.f32.mrf.mxu1 }
 0x22a   : > { %v2998_v31 = vadd.f32 %v2997_v10, %v2971_v30  ;;  %v1623_v8 = vadd.f32 %v1572_v16, %v4455_v47 }
 0x22b   : > { %v2246_v49 = vadd.f32 %v2194_v41, %v1874_v25  ;;  %v2383_v20 = vpop.f32.mrf.mxu0  ;;  %v2204_v59 = vpop.f32.mrf.mxu3 }
 0x22d   : > { %v2433_v57 = vadd.f32 %v2381_v44, %v2246_v49 }
 0x22f   : > { %v2937_v26 = vadd.f32 %v2936_v54, %v2433_v57  ;;  %v2972_v40 = vmul.f32 %v2433_v57, %v2433_v57 }
 0x230   : > { %v1824_v42 = vpop.f32.mrf.mxu2 }
 0x231   : > { %v2999_v56 = vadd.f32 %v2998_v31, %v2972_v40  ;;  %v1875_v50 = vadd.f32 %v1824_v42, %v1623_v8  ;;  %v1575_v52 = vpop.f32.mrf.mxu1 }
 0x232   : > { %v1624_v60 = vadd.f32 %v1575_v52, %v4461_v5  ;;  %v2643_v5 = vand.u32 15, %v2521_v17 }
 0x233   : > { %v2247_v38 = vadd.f32 %v2196_v55, %v1875_v50  ;;  %v2386_v4 = vpop.f32.mrf.mxu0  ;;  %v2206_v19 = vpop.f32.mrf.mxu3 }
 0x234   : > { %vm2885_vm11 = vcmp.lt.s32.totalorder %v2643_v5, 14 }
 0x235   : > { %v2434_v34 = vadd.f32 %v2383_v20, %v2247_v38 }
 0x237   : > { %v3677_v41 = vpack.c.bf16 %v2434_v34, %v2433_v57  ;;  %v2911_v36 = vsel %vm2883_vm10, %v2434_v34, 0.0  ;;  %v2523_v57 = vadd.s32 136, %v4609_v43 }
 0x238   : > { %v2938_v58 = vadd.f32 %v2937_v26, %v2911_v36  ;;  %v2973_v39 = vmul.f32 %v2911_v36, %v2911_v36  ;;  %v1827_v1 = vpop.f32.mrf.mxu2 }
 0x239   : > { %3730 = vst [vmem:[%s4641_s4 + $0x30] sm:$0xff] %v3677_v41   ;;  %v1876_v47 = vadd.f32 %v1827_v1, %v1624_v60  ;;  %v1577_v22 = vpop.f32.mrf.mxu1 }
 0x23a   : > { %v3000_v23 = vadd.f32 %v2999_v56, %v2973_v39  ;;  %v1625_v10 = vadd.f32 %v1577_v22, %v4476_v2 }
 0x23b   : > { %v2248_v12 = vadd.f32 %v2199_v63, %v1876_v47  ;;  %v2388_v11 = vpop.f32.mrf.mxu0  ;;  %v2209_v31 = vpop.f32.mrf.mxu3 }
 0x23d   : > { %v2435_v55 = vadd.f32 %v2386_v4, %v2248_v12  ;;  %v2525_v12 = vadd.s32 152, %v4609_v43 }
 0x23f   : > { %v2939_v9 = vadd.f32 %v2938_v58, %v2435_v55  ;;  %v2974_v7 = vmul.f32 %v2435_v55, %v2435_v55 }
 0x240   : > { %v1829_v18 = vpop.f32.mrf.mxu2 }
 0x241   : > { %v3001_v46 = vadd.f32 %v3000_v23, %v2974_v7  ;;  %v1877_v13 = vadd.f32 %v1829_v18, %v1625_v10  ;;  %v1580_v44 = vpop.f32.mrf.mxu1 }
 0x242   : > { %v1626_v54 = vadd.f32 %v1580_v44, %v4482_v6  ;;  %v2657_v6 = vand.u32 15, %v2523_v57 }
 0x243   : > { %v2249_v14 = vadd.f32 %v2201_v45, %v1877_v13  ;;  %v2391_v27 = vpop.f32.mrf.mxu0  ;;  %v2211_v52 = vpop.f32.mrf.mxu3 }
 0x244   : > { %vm2887_vm12 = vcmp.lt.s32.totalorder %v2657_v6, 14 }
 0x245   : > { %v2436_v29 = vadd.f32 %v2388_v11, %v2249_v14 }
 0x247   : > { %v3682_v63 = vpack.c.bf16 %v2436_v29, %v2435_v55  ;;  %v2913_v37 = vsel %vm2885_vm11, %v2436_v29, 0.0 }
 0x248   : > { %v2940_v30 = vadd.f32 %v2939_v9, %v2913_v37  ;;  %v2975_v48 = vmul.f32 %v2913_v37, %v2913_v37  ;;  %v1832_v25 = vpop.f32.mrf.mxu2 }
 0x249   : > { %3731 = vst [vmem:[%s4641_s4 + $0x38] sm:$0xff] %v3682_v63   ;;  %v1878_v2 = vadd.f32 %v1832_v25, %v1626_v54  ;;  %v1582_v49 = vpop.f32.mrf.mxu1 }
 0x24a   : > { %v3002_v16 = vadd.f32 %v3001_v46, %v2975_v48  ;;  %v1627_v8 = vadd.f32 %v1582_v49, %v4497_v3 }
 0x24b   : > { %v2250_v20 = vadd.f32 %v2204_v59, %v1878_v2  ;;  %v2393_v24 = vpop.f32.mrf.mxu0  ;;  %v2214_v11 = vpop.f32.mrf.mxu3 }
 0x24d   : > { %v2437_v45 = vadd.f32 %v2391_v27, %v2250_v20 }
 0x24f   : > { %v2941_v26 = vadd.f32 %v2940_v30, %v2437_v45  ;;  %v2976_v40 = vmul.f32 %v2437_v45, %v2437_v45 }
 0x250   : > { %v1834_v42 = vpop.f32.mrf.mxu2 }
 0x251   : > { %v3003_v61 = vadd.f32 %v3002_v16, %v2976_v40  ;;  %v1879_v56 = vadd.f32 %v1834_v42, %v1627_v8  ;;  %v1585_v50 = vpop.f32.mrf.mxu1  ;;  %v2527_v16 = vadd.s32 168, %v4609_v43 }
 0x252   : > { %v1628_v36 = vadd.f32 %v1585_v50, %v4503_v51  ;;  %v2671_v51 = vand.u32 15, %v2525_v12 }
 0x253   : > { %v2251_v38 = vadd.f32 %v2206_v19, %v1879_v56  ;;  %v2396_v4 = vpop.f32.mrf.mxu0  ;;  %v2216_v14 = vpop.f32.mrf.mxu3 }
 0x254   : > { %vm2889_vm13 = vcmp.lt.s32.totalorder %v2671_v51, 14 }
 0x255   : > { %v2438_v34 = vadd.f32 %v2393_v24, %v2251_v38 }
 0x257   : > { %v3687_v59 = vpack.c.bf16 %v2438_v34, %v2437_v45  ;;  %v2915_v41 = vsel %vm2887_vm12, %v2438_v34, 0.0 }
 0x258   : > { %v2942_v60 = vadd.f32 %v2941_v26, %v2915_v41  ;;  %v2977_v58 = vmul.f32 %v2915_v41, %v2915_v41  ;;  %v1837_v39 = vpop.f32.mrf.mxu2  ;;  %v2685_v26 = vand.u32 15, %v2527_v16 }
 0x259   : > { %3732 = vst [vmem:[%s4641_s4 + $0x40] sm:$0xff] %v3687_v59   ;;  %v1880_v3 = vadd.f32 %v1837_v39, %v1628_v36  ;;  %v1587_v47 = vpop.f32.mrf.mxu1 }
 0x25a   : > { %v3004_v1 = vadd.f32 %v3003_v61, %v2977_v58  ;;  %v1629_v9 = vadd.f32 %v1587_v47, %v4518_v33  ;;  %vm2891_vm14 = vcmp.lt.s32.totalorder %v2685_v26, 14 }
 0x25b   : > { %v2252_v23 = vadd.f32 %v2209_v31, %v1880_v3  ;;  %v2398_v22 = vpop.f32.mrf.mxu0  ;;  %v2529_v3 = vadd.s32 184, %v4609_v43 }
 0x25d   : > { %v2439_v17 = vadd.f32 %v2396_v4, %v2252_v23 }
 0x25f   : > { %v2943_v55 = vadd.f32 %v2942_v60, %v2439_v17  ;;  %v2978_v19 = vmul.f32 %v2439_v17, %v2439_v17 }
 0x260   : > { %v1839_v7 = vpop.f32.mrf.mxu2 }
 0x261   : > { %v3005_v10 = vadd.f32 %v3004_v1, %v2978_v19  ;;  %v1881_v18 = vadd.f32 %v1839_v7, %v1629_v9  ;;  %v1590_v5 = vpop.f32.mrf.mxu1 }
 0x262   : > { %v1630_v63 = vadd.f32 %v1590_v5, %v4524_v32  ;;  %v2219_v32 = vpop.f32.mrf.mxu3 }
 0x263   : > { %v2253_v46 = vadd.f32 %v2211_v52, %v1881_v18  ;;  %v2401_v13 = vpop.f32.mrf.mxu0 }
 0x265   : > { %v2440_v44 = vadd.f32 %v2398_v22, %v2253_v46 }
 0x267   : > { %v3692_v27 = vpack.c.bf16 %v2440_v44, %v2439_v17  ;;  %v2917_v29 = vsel %vm2889_vm13, %v2440_v44, 0.0 }
 0x268   : > { %v2944_v37 = vadd.f32 %v2943_v55, %v2917_v29  ;;  %v2979_v54 = vmul.f32 %v2917_v29, %v2917_v29  ;;  %v1842_v30 = vpop.f32.mrf.mxu2 }
 0x269   : > { %3733 = vst [vmem:[%s4641_s4 + $0x48] sm:$0xff] %v3692_v27   ;;  %v1882_v33 = vadd.f32 %v1842_v30, %v1630_v63  ;;  %v1592_v25 = vpop.f32.mrf.mxu1  ;;  %v2531_v63 = vadd.s32 200, %v4609_v43 }
 0x26a   : > { %v3006_v48 = vadd.f32 %v3005_v10, %v2979_v54  ;;  %v1631_v57 = vadd.f32 %v1592_v25, %v4539_v53  ;;  %v2221_v60 = vpop.f32.mrf.mxu3 }
 0x26b   : > { %v2254_v31 = vadd.f32 %v2214_v11, %v1882_v33  ;;  %v2403_v2 = vpop.f32.mrf.mxu0 }
 0x26d   : > { %v2441_v49 = vadd.f32 %v2401_v13, %v2254_v31 }
 0x26f   : > { %v2945_v20 = vadd.f32 %v2944_v37, %v2441_v49  ;;  %v2980_v24 = vmul.f32 %v2441_v49, %v2441_v49 }
 0x270   : > { %v1844_v45 = vpop.f32.mrf.mxu2 }
 0x271   : > { %v3007_v40 = vadd.f32 %v3006_v48, %v2980_v24  ;;  %v1883_v8 = vadd.f32 %v1844_v45, %v1631_v57  ;;  %v1595_v42 = vpop.f32.mrf.mxu1 }
 0x272   : > { %v1632_v38 = vadd.f32 %v1595_v42, %v4545_v62  ;;  %v2699_v62 = vand.u32 15, %v2529_v3  ;;  %v2224_v9 = vpop.f32.mrf.mxu3 }
 0x273   : > { %v2255_v6 = vadd.f32 %v2216_v14, %v1883_v8  ;;  %v2406_v61 = vpop.f32.mrf.mxu0 }
 0x274   : > { %vm2893_vm15 = vcmp.lt.s32.totalorder %v2699_v62, 14 }
 0x275   : > { %v2442_v56 = vadd.f32 %v2403_v2, %v2255_v6 }
 0x277   : > { %v3697_v50 = vpack.c.bf16 %v2442_v56, %v2441_v49  ;;  %v2919_v52 = vsel %vm2891_vm14, %v2442_v56, 0.0 }
 0x278   : > { %v2946_v4 = vadd.f32 %v2945_v20, %v2919_v52  ;;  %v2981_v34 = vmul.f32 %v2919_v52, %v2919_v52  ;;  %v1847_v59 = vpop.f32.mrf.mxu2  ;;  %v2533_v52 = vadd.s32 216, %v4609_v43 }
 0x279   : > { %3734 = vst [vmem:[%s4641_s4 + $0x50] sm:$0xff] %v3697_v50   ;;  %v1884_v53 = vadd.f32 %v1847_v59, %v1632_v38  ;;  %v1597_v36 = vpop.f32.mrf.mxu1 }
 0x27a   : > { %v3008_v41 = vadd.f32 %v3007_v40, %v2981_v34  ;;  %v1633_v22 = vadd.f32 %v1597_v36, %v4560_v28  ;;  %v2226_v54 = vpop.f32.mrf.mxu3 }
 0x27b   : > { %v2256_v58 = vadd.f32 %v2219_v32, %v1884_v53  ;;  %v2408_v39 = vpop.f32.mrf.mxu0  ;;  %v2727_v53 = vand.u32 15, %v2533_v52 }
 0x27d   : > { %v2443_v1 = vadd.f32 %v2406_v61, %v2256_v58  ;;  %vm2897_vm1 = vcmp.lt.s32.totalorder %v2727_v53, 14 }
 0x27f   : > { %v2947_v47 = vadd.f32 %v2946_v4, %v2443_v1  ;;  %v2982_v23 = vmul.f32 %v2443_v1, %v2443_v1 }
 0x280   : > { %v1849_v12 = vpop.f32.mrf.mxu2 }
 0x281   : > { %v3009_v11 = vadd.f32 %v3008_v41, %v2982_v23  ;;  %v1885_v17 = vadd.f32 %v1849_v12, %v1633_v22  ;;  %v1600_v55 = vpop.f32.mrf.mxu1 }
 0x282   : > { %v1634_v5 = vadd.f32 %v1600_v55, %v4566_v35  ;;  %v2713_v35 = vand.u32 15, %v2531_v63  ;;  %v2229_v8 = vpop.f32.mrf.mxu3 }
 0x283   : > { %v2257_v19 = vadd.f32 %v2221_v60, %v1885_v17  ;;  %v2411_v51 = vpop.f32.mrf.mxu0 }
 0x284   : > { %vm2895_vm0 = vcmp.lt.s32.totalorder %v2713_v35, 14 }
 0x285   : > { %v2444_v7 = vadd.f32 %v2408_v39, %v2257_v19 }
 0x287   : > { %v3702_v10 = vpack.c.bf16 %v2444_v7, %v2443_v1  ;;  %v2921_v18 = vsel %vm2893_vm15, %v2444_v7, 0.0 }
 0x288   : > { %v2948_v46 = vadd.f32 %v2947_v47, %v2921_v18  ;;  %v2983_v13 = vmul.f32 %v2921_v18, %v2921_v18  ;;  %v1852_v44 = vpop.f32.mrf.mxu2 }
 0x289   : > { %3735 = vst [vmem:[%s4641_s4 + $0x58] sm:$0xff] %v3702_v10   ;;  %v1886_v28 = vadd.f32 %v1852_v44, %v1634_v5  ;;  %v1602_v27 = vpop.f32.mrf.mxu1 }
 0x28a   : > { %v3010_v14 = vadd.f32 %v3009_v11, %v2983_v13  ;;  %v1635_v48 = vadd.f32 %v1602_v27, %v4583_v21  ;;  %v2231_v60 = vpop.f32.mrf.mxu3 }
 0x28b   : > { %v2258_v29 = vadd.f32 %v2224_v9, %v1886_v28  ;;  %v2413_v25 = vpop.f32.mrf.mxu0 }
 0x28d   : > { %v2445_v37 = vadd.f32 %v2411_v51, %v2258_v29 }
 0x28f   : > { %v2949_v30 = vadd.f32 %v2948_v46, %v2445_v37  ;;  %v2984_v33 = vmul.f32 %v2445_v37, %v2445_v37 }
 0x290   : > { %v1854_v31 = vpop.f32.mrf.mxu2 }
 0x291   : > { %v3011_v2 = vadd.f32 %v3010_v14, %v2984_v33  ;;  %v1887_v16 = vadd.f32 %v1854_v31, %v1635_v48  ;;  %v1605_v49 = vpop.f32.mrf.mxu1 }
 0x292   : > { %v1636_v26 = vadd.f32 %v1605_v49, %v4589_v15 }
 0x293   : > { %v2259_v20 = vadd.f32 %v2226_v54, %v1887_v16  ;;  %v2416_v61 = vpop.f32.mrf.mxu0 }
 0x295   : > { %v2446_v24 = vadd.f32 %v2413_v25, %v2259_v20 }
 0x297   : > { %v3707_v57 = vpack.c.bf16 %v2446_v24, %v2445_v37  ;;  %v2923_v45 = vsel %vm2895_vm0, %v2446_v24, 0.0 }
 0x298   : > { %v2950_v32 = vadd.f32 %v2949_v30, %v2923_v45  ;;  %v2985_v40 = vmul.f32 %v2923_v45, %v2923_v45  ;;  %v1857_v42 = vpop.f32.mrf.mxu2 }
 0x299   : > { %3736 = vst [vmem:[%s4641_s4 + $0x60] sm:$0xff] %v3707_v57   ;;  %v1888_v21 = vadd.f32 %v1857_v42, %v1636_v26  ;;  %v1607_v50 = vpop.f32.mrf.mxu1 }
 0x29a   : > { %v3012_v6 = vadd.f32 %v3011_v2, %v2985_v40  ;;  %v1637_v59 = vadd.f32 %v1607_v50, %v4606_v0 }
 0x29b   : > { %v2260_v56 = vadd.f32 %v2229_v8, %v1888_v21  ;;  %v2418_v43 = vpop.f32.mrf.mxu0 }
 0x29d   : > { %v2447_v38 = vadd.f32 %v2416_v61, %v2260_v56 }
 0x29f   : > { %v2951_v4 = vadd.f32 %v2950_v32, %v2447_v38  ;;  %v2986_v34 = vmul.f32 %v2447_v38, %v2447_v38 }
 0x2a0   : > { %v1859_v15 = vpop.f32.mrf.mxu2 }
 0x2a1   : > { %v3013_v41 = vadd.f32 %v3012_v6, %v2986_v34  ;;  %v1889_v36 = vadd.f32 %v1859_v15, %v1637_v59 }
 0x2a3   : > { %v2261_v58 = vadd.f32 %v2231_v60, %v1889_v36 }
 0x2a5   : > { %v2448_v39 = vadd.f32 %v2418_v43, %v2261_v58 }
 0x2a7   : > { %v3712_v0 = vpack.c.bf16 %v2448_v39, %v2447_v38  ;;  %v2925_v3 = vsel %vm2897_vm1, %v2448_v39, 0.0 }
 0x2a8   : > { %v2952_v1 = vadd.f32 %v2951_v4, %v2925_v3  ;;  %v2987_v47 = vmul.f32 %v2925_v3, %v2925_v3 }
 0x2a9   : > { %3737 = vst [vmem:[%s4641_s4 + $0x68] sm:$0xff] %v3712_v0  }
 0x2aa   : > { %v2953_v23 = vrot.slane %v2952_v1, 4  ;;  %v3014_v22 = vadd.f32 %v3013_v41, %v2987_v47 }
 0x2ab   : > { %3817 = shalt.err (!%p3814_p3)
}
 0x2ac   : > { %s3886_s28 = smov 64   ;;  %s3887_s30 = smov 4   ;;  %v2954_v12 = vadd.f32 %v2953_v23, %v2952_v1  ;;  %v3015_v62 = vrot.slane %v3014_v22, 4 }
 0x2ad   : > { %3744 = dma.vmem_to_hbm [thread:$0]  (%p3946_p5), %s3041_s9, 1792, %s3043_s10, %s3023_s11, %s3886_s28, %s3886_s28, %s3887_s30  }
 0x2ae   : > { %s3156_s4 = sshll.u32 %s4623_s29, 1  ;;  %s3562_s5 = sshll.u32 %s3929_s16, 1  ;;  %v2955_v11 = vrot.slane %v2954_v12, 2  ;;  %v3016_v17 = vadd.f32 %v3015_v62, %v3014_v22 }
 0x2af   : > { %s3055_s8 = scalar_lea.hbm %s4808_s3, %s3562_s5  ;;  %s174_s17 = scalar_lea.vmem [#allocation4], %s3156_s4 }
 0x2b0   : > { %v2956_v55 = vadd.f32 %v2955_v11, %v2954_v12  ;;  %v3017_v19 = vrot.slane %v3016_v17, 2  ;;  %s3057_s19 = sshll.u32 %s174_s17, 4  ;;  %s3059_s20 = sshll.u32 %s3055_s8, 4  ;;  %s3058_s19 = int_to_ptr.vmem [resolvable:$true] %s3057_s19  ;;  %s3060_s20 = int_to_ptr.hbm [resolvable:$true] %s3059_s20 }
 0x2b1   : > { %s3028_s16 = scalar_lea.sflag [#allocation5], %s4623_s29  ;;  %s3832_s9 = sshra.s32 %s3060_s20, 4  ;;  %s3833_s9 = int_to_ptr.hbm [resolvable:$true] %s3832_s9 }
 0x2b2   : > { %v2957_v9 = vrot.slane %v2956_v55, 1  ;;  %v3018_v7 = vadd.f32 %v3017_v19, %v3016_v17  ;;  %s3834_s10 = scalar_lea.hbm %s3833_s9, 2  ;;  %s3838_s25 = scalar_lea.hbm %s4808_s3, 4 }
 0x2b3   : > { %p3835_p4 = scmp.ne.s32.totalorder %s3833_s9, %s3834_s10  ;;  %p3839_p9 = scmp.lt.s32.totalorder %s3833_s9, %s4808_s3 }
 0x2b4   : > { %v2958_v51 = vadd.f32 %v2957_v9, %v2956_v55  ;;  %v3019_v10 = vrot.slane %v3018_v7, 1  ;;  %p3840_p10 = scmp.lt.s32.totalorder %s3838_s25, %s3834_s10 }
 0x2b5   : > { %p3836_p7 = pnand %p3835_p4, %p3946_p5 }
 0x2b6   : > { %2959 = vst [vmem:[%s174_s17] sm:$0x1] %v2958_v51  ;;  %v3020_v18 = vadd.f32 %v3019_v10, %v3018_v7  ;;  %p3841_p11 = por %p3840_p10, %p3839_p9 }
 0x2b7   : > { %p3837_p8 = pneg %p3836_p7 }
 0x2b8   : > { %3021 = vst [vmem:[%s174_s17 + $0x1] sm:$0x1] %v3020_v18 }
 0x2b9   : > { %p3842_p12 = pnand %p3841_p11, %p3837_p8 }
 0x2bb   : > { %3845 = shalt.err (!%p3842_p12)
}
 0x2bc   : > { %3745 = dma.vmem_to_hbm [thread:$0]  (%p3946_p5), %s3058_s19, 32, %s3060_s20, %s3028_s16  }
 0x2bd PF: > { %p3755_p13 = scmp.ge.s32.totalorder %s3884_s15, 2  ;;  %s3071_s29 = sand.u32 1, %s3872_s12  }
 0x2be   : > { %s3072_s28 = scalar_lea.sflag [#allocation3], %s3071_s29 }
 0x2bf   : > { %p3749_p0 = pnand %p3755_p13, %p3950_p6 }
 0x2c1   : > { %p3750_p1 = pneg %p3749_p0 }
 0x2c3   : > { %3863 = dma.done.wait (%p3750_p1), %s3072_s28, 1792  }
 0x2c4   : > { %3865 = vsyncadd (%p3750_p1), %s3072_s28, 4294965504  ;;  %s3082_s30 = scalar_lea.sflag [#allocation5], %s3071_s29 }
 0x2c5   : > { %3867 = dma.done.wait (%p3750_p1), %s3082_s30, 32  }
 0x2c6   : > { %3869 = vsyncadd (%p3750_p1), %s3082_s30, 4294967264  ;;  %p17_p5 = scmp.ge.s32.totalorder %s3933_s18, 4   ;;  %s4827_s12 = smov %s3876_s13 }
 0x2c7   : > { %s4828_s13 = smov %s3880_s14  ;;  %s4829_s14 = smov %s3944_s21 }
 0x2c8   : > { %s4830_s15 = smov %s3933_s18  ;;  %19 = sbr.rel (!%p17_p5) target bundleno = 5 (0x5), region = 88 }
 0x2cd   :  { %3088 = vsyncpa [#allocation3], 1 }
 0x2ce   :  { %3090 = vsyncpa [#allocation3 + $0x1], 1 }
 0x2cf   :  { %3091 = vsyncpa [#allocation5], 1 }
 0x2d0   :  { %3093 = vsyncpa [#allocation5 + $0x1], 1 }

</bundles_post_ra>
